<compile_context>
chip_gen: v7x
topology: tpu7x:2x2x1
jax: 0.10.0
libtpu: 0.0.40
codegen_flags: <defaults>
</compile_context>

<pallas_src>
import functools

import jax
import jax.numpy as jnp
from jax import lax
from jax.experimental import pallas as pl
from jax.experimental.pallas import tpu as pltpu

K = 4
STRIDE = 2
PAD = 1
BN_EPS = 1e-5
LANE = 128


def _pass1_matmul_stats_kernel(p_ref, w_ref, b_ref, y_ref, sum_ref, sq_ref):
  """grid = (4 phases, M tiles). y = patches @ w + bias; accumulate stats."""
  first = jnp.logical_and(pl.program_id(0) == 0, pl.program_id(1) == 0)

  @pl.when(first)
  def _():
    sum_ref[...] = jnp.zeros_like(sum_ref)
    sq_ref[...] = jnp.zeros_like(sq_ref)

  y = jnp.dot(p_ref[...], w_ref[...], preferred_element_type=jnp.float32)
  y = y + b_ref[...]                       # conv-transpose bias (f32)
  y_ref[...] = y

  # Global (across the whole grid) per-channel sum / sum-of-squares, kept in
  # resident output blocks (same block index every step -> accumulator).
  sum_ref[...] += jnp.sum(y, axis=0, keepdims=True)
  sq_ref[...] += jnp.sum(y * y, axis=0, keepdims=True)


def _pass2_bn_prelu_kernel(y_ref, scale_ref, shift_ref, alpha_ref, out_ref):
  """Apply folded BatchNorm (scale/shift) + PReLU, tile-parallel over rows."""
  a = alpha_ref[0]                         # SMEM scalar
  z = y_ref[...] * scale_ref[...] + shift_ref[...]
  out_ref[...] = jnp.where(z >= 0.0, z, a * z)


def _pick_tile(m, cap=1024):
  """Largest power-of-two row tile (>=8) dividing m, capped at `cap`."""
  t = cap
  while t >= 8:
    if m % t == 0:
      return t
    t //= 2
  return m  # fall back to a single full block (block == full dim is legal)


def _phase_patches_and_weights(x_nhwc, weight):
  """Sub-pixel decomposition of ConvTranspose2d(k=4, s=2, p=1).

  Output pixel (2q+py, 2r+px) only sees the non-zero taps of the dilated
  input, i.e. a 2x2 neighborhood of the original input and a 2x2 slice of the
  (flipped) kernel.  Returns per-phase im2col patches (4, N*H*W, 4*Cin) and
  per-phase weight matrices (4, 4*Cin, Cout).
  """
  n, h, w, cin = x_nhwc.shape
  cout = weight.shape[1]
  # ConvTranspose == conv of the dilated/padded input with the spatially
  # flipped, channel-swapped kernel; arrange as (kh, kw, ci, co).
  w_flip = jnp.transpose(weight[:, :, ::-1, ::-1], (2, 3, 0, 1))
  x_pad = jnp.pad(x_nhwc, ((0, 0), (1, 1), (1, 1), (0, 0)))

  # phase 0 uses kernel taps {0, 2} at input rows {q-1, q};
  # phase 1 uses kernel taps {1, 3} at input rows {q, q+1} (same for columns).
  k_taps = ((0, 2), (1, 3))
  offs = ((0, 1), (1, 2))   # row/col offsets in the 1-padded input

  patches, weights = [], []
  for py in range(2):
    for px in range(2):
      cols = []
      for a in range(2):
        for b in range(2):
          ro, co = offs[py][a], offs[px][b]
          cols.append(x_pad[:, ro:ro + h, co:co + w, :])
      ph = jnp.stack(cols, axis=3)                    # (N, H, W, 4, Cin)
      patches.append(ph.reshape(n * h * w, 4 * cin))
      wsel = jnp.stack(
          [jnp.stack([w_flip[k_taps[py][a], k_taps[px][b]]
                      for b in range(2)], axis=0)
           for a in range(2)], axis=0)                # (2, 2, Cin, Cout)
      weights.append(wsel.reshape(4 * cin, cout))
  return jnp.stack(patches, axis=0), jnp.stack(weights, axis=0)


@functools.partial(jax.jit, static_argnames=("matmul_dtype",))
def deconvlayer_forward(x_nchw, weight, bias, gamma, beta, alpha,
                        matmul_dtype=jnp.bfloat16):
  """x_nchw: (N, Cin, H, W). weight: (Cin, Cout, K, K) (PyTorch layout)."""
  n, cin, h, w = x_nchw.shape
  cout = weight.shape[1]
  oh, ow = STRIDE * h, STRIDE * w
  cpad = ((cout + LANE - 1) // LANE) * LANE
  kdim = 4 * cin

  x_nhwc = jnp.transpose(x_nchw, (0, 2, 3, 1)).astype(jnp.float32)
  patches, w_phases = _phase_patches_and_weights(
      x_nhwc, weight.astype(jnp.float32))
  m = n * h * w                   # rows per phase
  m_total = 4 * m                 # == n * oh * ow (BN reduction size)

  patches = patches.astype(matmul_dtype)                        # (4, M, Kdim)
  w_phases = jnp.pad(w_phases,
                     ((0, 0), (0, 0), (0, cpad - cout))
                     ).astype(matmul_dtype)                     # (4, Kdim, Cpad)
  b_row = jnp.pad(bias.astype(jnp.float32), (0, cpad - cout)).reshape(1, cpad)
  g_pad = jnp.pad(gamma.astype(jnp.float32), (0, cpad - cout))
  be_pad = jnp.pad(beta.astype(jnp.float32), (0, cpad - cout))
  a_arr = jnp.reshape(alpha, (1,)).astype(jnp.float32)

  # ---- pass 1: tiled matmul + bias, streaming y, accumulating BN stats ----
  tm1 = _pick_tile(m)
  y, ysum, ysq = pl.pallas_call(
      _pass1_matmul_stats_kernel,
      out_shape=(jax.ShapeDtypeStruct((4, m, cpad), jnp.float32),
                 jax.ShapeDtypeStruct((1, cpad), jnp.float32),
                 jax.ShapeDtypeStruct((1, cpad), jnp.float32)),
      grid=(4, m // tm1),
      in_specs=[
          pl.BlockSpec((None, tm1, kdim), lambda p, i: (p, i, 0)),   # patches
          pl.BlockSpec((None, kdim, cpad), lambda p, i: (p, 0, 0)),  # weights
          pl.BlockSpec((1, cpad), lambda p, i: (0, 0)),              # bias
      ],
      out_specs=(
          pl.BlockSpec((None, tm1, cpad), lambda p, i: (p, i, 0)),   # y
          pl.BlockSpec((1, cpad), lambda p, i: (0, 0)),              # sum
          pl.BlockSpec((1, cpad), lambda p, i: (0, 0)),              # sum sq
      ),
      compiler_params=pltpu.CompilerParams(
          dimension_semantics=("arbitrary", "arbitrary")),
  )(patches, w_phases, b_row)

  # ---- tiny per-channel BN folding (train-mode, biased variance) ----
  mt = jnp.float32(m_total)
  mean = ysum[0] / mt
  var = jnp.maximum(ysq[0] / mt - mean * mean, 0.0)
  scale = g_pad * lax.rsqrt(var + BN_EPS)
  shift = be_pad - mean * scale

  # ---- pass 2: apply folded BN + PReLU, fully parallel over row tiles ----
  y_flat = y.reshape(4 * m, cpad)
  tm2 = _pick_tile(4 * m)
  out_flat = pl.pallas_call(
      _pass2_bn_prelu_kernel,
      out_shape=jax.ShapeDtypeStruct((4 * m, cpad), jnp.float32),
      grid=(4 * m // tm2,),
      in_specs=[
          pl.BlockSpec((tm2, cpad), lambda i: (i, 0)),               # y
          pl.BlockSpec((1, cpad), lambda i: (0, 0)),                 # scale
          pl.BlockSpec((1, cpad), lambda i: (0, 0)),                 # shift
          pl.BlockSpec(memory_space=pltpu.MemorySpace.SMEM),         # alpha
      ],
      out_specs=pl.BlockSpec((tm2, cpad), lambda i: (i, 0)),
      compiler_params=pltpu.CompilerParams(
          dimension_semantics=("parallel",)),
  )(y_flat, scale.reshape(1, cpad), shift.reshape(1, cpad), a_arr)

  # ---- interleave the 4 sub-pixel phases back to (N, OH, OW, Cout) ----
  out = out_flat.reshape(2, 2, n, h, w, cpad)[..., :cout]
  out = jnp.transpose(out, (2, 3, 0, 4, 1, 5)).reshape(n, oh, ow, cout)
  return jnp.transpose(out, (0, 3, 1, 2))          # back to NCHW


def _reference_forward(x_nchw, weight, bias, gamma, beta, alpha):
  """Pure-JAX reference mirroring PyTorch semantics (for validation)."""
  cout = weight.shape[1]
  w_oihw = jnp.transpose(weight[:, :, ::-1, ::-1], (1, 0, 2, 3))
  y = lax.conv_general_dilated(
      x_nchw.astype(jnp.float32), w_oihw.astype(jnp.float32),
      window_strides=(1, 1), padding=((2, 2), (2, 2)),
      lhs_dilation=(STRIDE, STRIDE),
      dimension_numbers=('NCHW', 'OIHW', 'NCHW'))
  y = y + bias.reshape(1, cout, 1, 1)
  mean = jnp.mean(y, axis=(0, 2, 3), keepdims=True)
  var = jnp.mean((y - mean) ** 2, axis=(0, 2, 3), keepdims=True)
  y = (y - mean) / jnp.sqrt(var + BN_EPS)
  y = y * gamma.reshape(1, cout, 1, 1) + beta.reshape(1, cout, 1, 1)
  return jnp.where(y >= 0, y, alpha * y)


if __name__ == "__main__":
  key = jax.random.PRNGKey(0)
  k_x, k_w, k_b, k_g, k_be = jax.random.split(key, 5)

  # Small deterministic config: N=2, Cin=4, H=W=16, Cout=8.
  N, CIN, H, W = 2, 4, 16, 16
  COUT = 8

  x = jax.random.normal(k_x, (N, CIN, H, W), dtype=jnp.float32)
  weight = 0.1 * jax.random.normal(k_w, (CIN, COUT, K, K), dtype=jnp.float32)
  bias = 0.1 * jax.random.normal(k_b, (COUT,), dtype=jnp.float32)
  gamma = 1.0 + 0.1 * jax.random.normal(k_g, (COUT,), dtype=jnp.float32)
  beta = 0.1 * jax.random.normal(k_be, (COUT,), dtype=jnp.float32)
  alpha = jnp.float32(0.25)                 # PReLU default init

  ref = jax.block_until_ready(
      _reference_forward(x, weight, bias, gamma, beta, alpha))

  # Algorithmic check (phase decomposition + tiled BN) with f32 matmul inputs.
  out_f32 = jax.block_until_ready(
      deconvlayer_forward(x, weight, bias, gamma, beta, alpha,
                          matmul_dtype=jnp.float32))
  assert out_f32.shape == (N, COUT, 2 * H, 2 * W), out_f32.shape
  assert jnp.allclose(out_f32, ref, atol=1e-3, rtol=1e-3), (
      float(jnp.max(jnp.abs(out_f32 - ref))))

  # Default fast path: bf16 matmul inputs, f32 accumulation / BN / PReLU.
  out = jax.block_until_ready(
      deconvlayer_forward(x, weight, bias, gamma, beta, alpha))
  assert out.shape == (N, COUT, 2 * H, 2 * W), out.shape
  assert jnp.allclose(out, ref, atol=3e-2, rtol=3e-2), (
      float(jnp.max(jnp.abs(out - ref))))

  print("KERNEL_OK")
</pallas_src>

<mosaic_0001>
module attributes {stable_mosaic.version = 11 : i64} {
  func.func @_pass2_bn_prelu_kernel(%arg0: i32, %arg1: memref<1024x128xf32, #tpu.memory_space<vmem>>, %arg2: memref<1x128xf32, #tpu.memory_space<vmem>>, %arg3: memref<1x128xf32, #tpu.memory_space<vmem>>, %arg4: memref<1xf32, #tpu.memory_space<smem>>, %arg5: memref<1024x128xf32, #tpu.memory_space<vmem>>) attributes {dimension_semantics = [#tpu.dimension_semantics<parallel>], iteration_bounds = array<i64: 2>, scalar_prefetch = 0 : i64, scratch_operands = 0 : i64, tpu.core_type = #tpu.core_type<tc>, window_params = [{transform_indices = @transform_0, window_bounds = array<i64: 1024, 128>}, {pipeline_mode = #tpu.pipeline_mode<synchronous>, transform_indices = @transform_1, window_bounds = array<i64: 1, 128>}, {pipeline_mode = #tpu.pipeline_mode<synchronous>, transform_indices = @transform_2, window_bounds = array<i64: 1, 128>}, {transform_indices = @transform_3, window_bounds = array<i64: 1>}, {transform_indices = @transform_4, window_bounds = array<i64: 1024, 128>}]} {
    %c0 = arith.constant 0 : index
    %0 = memref.load %arg4[%c0] : memref<1xf32, #tpu.memory_space<smem>>
    %c0_0 = arith.constant 0 : index
    %c0_1 = arith.constant 0 : index
    %1 = vector.load %arg1[%c0_0, %c0_1] : memref<1024x128xf32, #tpu.memory_space<vmem>>, vector<1024x128xf32>
    %c0_2 = arith.constant 0 : index
    %c0_3 = arith.constant 0 : index
    %2 = vector.load %arg2[%c0_2, %c0_3] : memref<1x128xf32, #tpu.memory_space<vmem>>, vector<1x128xf32>
    %3 = vector.broadcast %2 : vector<1x128xf32> to vector<1024x128xf32>
    %4 = arith.mulf %1, %3 : vector<1024x128xf32>
    %c0_4 = arith.constant 0 : index
    %c0_5 = arith.constant 0 : index
    %5 = vector.load %arg3[%c0_4, %c0_5] : memref<1x128xf32, #tpu.memory_space<vmem>>, vector<1x128xf32>
    %6 = vector.broadcast %5 : vector<1x128xf32> to vector<1024x128xf32>
    %7 = arith.addf %4, %6 : vector<1024x128xf32>
    %cst = arith.constant 0.000000e+00 : f32
    %8 = vector.broadcast %cst : f32 to vector<1024x128xf32>
    %9 = arith.cmpf oge, %7, %8 : vector<1024x128xf32>
    %10 = vector.broadcast %0 : f32 to vector<1024x128xf32>
    %11 = arith.mulf %10, %7 : vector<1024x128xf32>
    %12 = arith.select %9, %7, %11 : vector<1024x128xi1>, vector<1024x128xf32>
    %c0_6 = arith.constant 0 : index
    %c0_7 = arith.constant 0 : index
    %13 = vector.load %arg5[%c0_6, %c0_7] : memref<1024x128xf32, #tpu.memory_space<vmem>>, vector<1024x128xf32>
    tpu.vector_store %arg5[%c0_6, %c0_7], %12 {strides = array<i32>} : memref<1024x128xf32, #tpu.memory_space<vmem>>, vector<1024x128xf32>,
    return
  }
  func.func @transform_0(%arg0: i32) -> (i32, i32) {
    %c0_i32 = arith.constant 0 : i32
    %c0_i32_0 = arith.constant 0 : i32
    return %arg0, %c0_i32 : i32, i32
  }
  func.func @transform_1(%arg0: i32) -> (i32, i32) {
    %c0_i32 = arith.constant 0 : i32
    %c0_i32_0 = arith.constant 0 : i32
    %c0_i32_1 = arith.constant 0 : i32
    return %c0_i32, %c0_i32_0 : i32, i32
  }
  func.func @transform_2(%arg0: i32) -> (i32, i32) {
    %c0_i32 = arith.constant 0 : i32
    %c0_i32_0 = arith.constant 0 : i32
    %c0_i32_1 = arith.constant 0 : i32
    return %c0_i32, %c0_i32_0 : i32, i32
  }
  func.func @transform_3(%arg0: i32) -> i32 {
    %c0_i32 = arith.constant 0 : i32
    %c0_i32_0 = arith.constant 0 : i32
    return %c0_i32 : i32
  }
  func.func @transform_4(%arg0: i32) -> (i32, i32) {
    %c0_i32 = arith.constant 0 : i32
    %c0_i32_0 = arith.constant 0 : i32
    return %arg0, %c0_i32 : i32, i32
  }
}

module attributes {stable_mosaic.version = 11 : i64} {
  func.func @_pass1_matmul_stats_kernel(%arg0: i32, %arg1: i32, %arg2: memref<1x512x16xf32, #tpu.memory_space<vmem>>, %arg3: memref<1x16x128xf32, #tpu.memory_space<vmem>>, %arg4: memref<1x128xf32, #tpu.memory_space<vmem>>, %arg5: memref<1x512x128xf32, #tpu.memory_space<vmem>>, %arg6: memref<1x128xf32, #tpu.memory_space<vmem>>, %arg7: memref<1x128xf32, #tpu.memory_space<vmem>>) attributes {dimension_semantics = [#tpu.dimension_semantics<arbitrary>, #tpu.dimension_semantics<arbitrary>], iteration_bounds = array<i64: 4, 1>, scalar_prefetch = 0 : i64, scratch_operands = 0 : i64, tpu.core_type = #tpu.core_type<tc>, window_params = [{transform_indices = @transform_0, window_bounds = array<i64: 1, 512, 16>}, {transform_indices = @transform_1, window_bounds = array<i64: 1, 16, 128>}, {pipeline_mode = #tpu.pipeline_mode<synchronous>, transform_indices = @transform_2, window_bounds = array<i64: 1, 128>}, {transform_indices = @transform_3, window_bounds = array<i64: 1, 512, 128>}, {pipeline_mode = #tpu.pipeline_mode<synchronous>, transform_indices = @transform_4, window_bounds = array<i64: 1, 128>}, {pipeline_mode = #tpu.pipeline_mode<synchronous>, transform_indices = @transform_5, window_bounds = array<i64: 1, 128>}]} {
    %c0_i32 = arith.constant 0 : i32
    %0 = arith.cmpi eq, %arg0, %c0_i32 : i32
    %c0_i32_0 = arith.constant 0 : i32
    %1 = arith.cmpi eq, %arg1, %c0_i32_0 : i32
    %2 = arith.andi %0, %1 : i1
    %3 = arith.extui %2 : i1 to i32
    %c0_i32_1 = arith.constant 0 : i32
    %4 = arith.cmpi ne, %3, %c0_i32_1 : i32
    scf.if %4 {
      %cst_22 = arith.constant 0.000000e+00 : f32
      %27 = vector.broadcast %cst_22 : f32 to vector<1x128xf32>
      %c0_23 = arith.constant 0 : index
      %c0_24 = arith.constant 0 : index
      %28 = vector.load %arg6[%c0_23, %c0_24] : memref<1x128xf32, #tpu.memory_space<vmem>>, vector<1x128xf32>
      tpu.vector_store %arg6[%c0_23, %c0_24], %27 {strides = array<i32>} : memref<1x128xf32, #tpu.memory_space<vmem>>, vector<1x128xf32>,
      %cst_25 = arith.constant 0.000000e+00 : f32
      %29 = vector.broadcast %cst_25 : f32 to vector<1x128xf32>
      %c0_26 = arith.constant 0 : index
      %c0_27 = arith.constant 0 : index
      %30 = vector.load %arg7[%c0_26, %c0_27] : memref<1x128xf32, #tpu.memory_space<vmem>>, vector<1x128xf32>
      tpu.vector_store %arg7[%c0_26, %c0_27], %29 {strides = array<i32>} : memref<1x128xf32, #tpu.memory_space<vmem>>, vector<1x128xf32>,
    } else {
    }
    %c0 = arith.constant 0 : index
    %c0_2 = arith.constant 0 : index
    %c0_3 = arith.constant 0 : index
    %5 = vector.load %arg2[%c0, %c0_2, %c0_3] : memref<1x512x16xf32, #tpu.memory_space<vmem>>, vector<1x512x16xf32>
    %6 = vector.shape_cast %5 : vector<1x512x16xf32> to vector<512x16xf32>
    %c0_4 = arith.constant 0 : index
    %c0_5 = arith.constant 0 : index
    %c0_6 = arith.constant 0 : index
    %7 = vector.load %arg3[%c0_4, %c0_5, %c0_6] : memref<1x16x128xf32, #tpu.memory_space<vmem>>, vector<1x16x128xf32>
    %8 = vector.shape_cast %7 : vector<1x16x128xf32> to vector<16x128xf32>
    %cst = arith.constant dense<0.000000e+00> : vector<512x128xf32>
    %9 = tpu.matmul %6, %8, %cst {dimension_numbers = #tpu.dot_dimension_numbers<[1], [0], [0], [1], [0, 0, 1, 1], [], []>} : vector<512x16xf32>, vector<16x128xf32>, vector<512x128xf32> -> vector<512x128xf32>
    %c0_7 = arith.constant 0 : index
    %c0_8 = arith.constant 0 : index
    %10 = vector.load %arg4[%c0_7, %c0_8] : memref<1x128xf32, #tpu.memory_space<vmem>>, vector<1x128xf32>
    %11 = vector.broadcast %10 : vector<1x128xf32> to vector<512x128xf32>
    %12 = arith.addf %9, %11 : vector<512x128xf32>
    %c0_9 = arith.constant 0 : index
    %c0_10 = arith.constant 0 : index
    %c0_11 = arith.constant 0 : index
    %13 = vector.load %arg5[%c0_9, %c0_10, %c0_11] : memref<1x512x128xf32, #tpu.memory_space<vmem>>, vector<1x512x128xf32>
    %14 = vector.shape_cast %13 : vector<1x512x128xf32> to vector<512x128xf32>
    %15 = vector.shape_cast %12 : vector<512x128xf32> to vector<1x512x128xf32>
    tpu.vector_store %arg5[%c0_9, %c0_10, %c0_11], %15 {strides = array<i32>} : memref<1x512x128xf32, #tpu.memory_space<vmem>>, vector<1x512x128xf32>,
    %c0_12 = arith.constant 0 : index
    %c0_13 = arith.constant 0 : index
    %16 = vector.load %arg6[%c0_12, %c0_13] : memref<1x128xf32, #tpu.memory_space<vmem>>, vector<1x128xf32>
    %cst_14 = arith.constant dense<0.000000e+00> : vector<128xf32>
    %17 = vector.multi_reduction <add>, %12, %cst_14 [0] : vector<512x128xf32> to vector<128xf32>
    %18 = vector.shape_cast %17 : vector<128xf32> to vector<1x128xf32>
    %19 = arith.addf %16, %18 : vector<1x128xf32>
    %c0_15 = arith.constant 0 : index
    %c0_16 = arith.constant 0 : index
    %20 = vector.load %arg6[%c0_15, %c0_16] : memref<1x128xf32, #tpu.memory_space<vmem>>, vector<1x128xf32>
    tpu.vector_store %arg6[%c0_15, %c0_16], %19 {strides = array<i32>} : memref<1x128xf32, #tpu.memory_space<vmem>>, vector<1x128xf32>,
    %c0_17 = arith.constant 0 : index
    %c0_18 = arith.constant 0 : index
    %21 = vector.load %arg7[%c0_17, %c0_18] : memref<1x128xf32, #tpu.memory_space<vmem>>, vector<1x128xf32>
    %22 = arith.mulf %12, %12 : vector<512x128xf32>
    %cst_19 = arith.constant dense<0.000000e+00> : vector<128xf32>
    %23 = vector.multi_reduction <add>, %22, %cst_19 [0] : vector<512x128xf32> to vector<128xf32>
    %24 = vector.shape_cast %23 : vector<128xf32> to vector<1x128xf32>
    %25 = arith.addf %21, %24 : vector<1x128xf32>
    %c0_20 = arith.constant 0 : index
    %c0_21 = arith.constant 0 : index
    %26 = vector.load %arg7[%c0_20, %c0_21] : memref<1x128xf32, #tpu.memory_space<vmem>>, vector<1x128xf32>
    tpu.vector_store %arg7[%c0_20, %c0_21], %25 {strides = array<i32>} : memref<1x128xf32, #tpu.memory_space<vmem>>, vector<1x128xf32>,
    return
  }
  func.func @transform_0(%arg0: i32, %arg1: i32) -> (i32, i32, i32) {
    %c0_i32 = arith.constant 0 : i32
    %c0_i32_0 = arith.constant 0 : i32
    return %arg0, %arg1, %c0_i32 : i32, i32, i32
  }
  func.func @transform_1(%arg0: i32, %arg1: i32) -> (i32, i32, i32) {
    %c0_i32 = arith.constant 0 : i32
    %c0_i32_0 = arith.constant 0 : i32
    %c0_i32_1 = arith.constant 0 : i32
    return %arg0, %c0_i32, %c0_i32_0 : i32, i32, i32
  }
  func.func @transform_2(%arg0: i32, %arg1: i32) -> (i32, i32) {
    %c0_i32 = arith.constant 0 : i32
    %c0_i32_0 = arith.constant 0 : i32
    %c0_i32_1 = arith.constant 0 : i32
    return %c0_i32, %c0_i32_0 : i32, i32
  }
  func.func @transform_3(%arg0: i32, %arg1: i32) -> (i32, i32, i32) {
    %c0_i32 = arith.constant 0 : i32
    %c0_i32_0 = arith.constant 0 : i32
    return %arg0, %arg1, %c0_i32 : i32, i32, i32
  }
  func.func @transform_4(%arg0: i32, %arg1: i32) -> (i32, i32) {
    %c0_i32 = arith.constant 0 : i32
    %c0_i32_0 = arith.constant 0 : i32
    %c0_i32_1 = arith.constant 0 : i32
    return %c0_i32, %c0_i32_0 : i32, i32
  }
  func.func @transform_5(%arg0: i32, %arg1: i32) -> (i32, i32) {
    %c0_i32 = arith.constant 0 : i32
    %c0_i32_0 = arith.constant 0 : i32
    %c0_i32_1 = arith.constant 0 : i32
    return %c0_i32, %c0_i32_0 : i32, i32
  }
}

</mosaic_0001>

<bundles_post_ra>
// kernel: deconvlayer_forward.2
= control target key start
LH: loop header
LB: loop body
LE: loop exit
PB: predicated region body
PF: predicated region fallthrough
CT: control target
= control target key end

     0   :  { %s1656_s18 = smov 0   ;;  %s1658_s19 = smov 0   ;;  %s2167_s0 = inlined_call_operand.vmem [shape: f32[4,512,16], index: 0, kind: input, shape index: {}]   ;;  %s2168_s1 = inlined_call_operand.vmem [shape: f32[4,16,128], index: 1, kind: input, shape index: {}]   ;;  %s2169_s2 = inlined_call_operand.vmem [shape: f32[1,128], index: 2, kind: input, shape index: {}]   ;;  %s2170_s3 = inlined_call_operand.vmem [shape: f32[4,512,128], index: 3, kind: output, shape index: {0}]   ;;  %s2171_s4 = inlined_call_operand.vmem [shape: f32[1,128], index: 4, kind: output, shape index: {1}]   ;;  %s2172_s5 = inlined_call_operand.vmem [shape: f32[1,128], index: 5, kind: output, shape index: {2}]  }
   0x1   :  { %s1660_s20 = smov 0  }
   0x2 LB: > { %s28_s21 = sadd.s32 1, %s1619_s19  ;;  %p1325_p0 = scmp.ge.s32.totalorder %s1623_s20, 1  ;;  %s1623_s20 = sphi %s1660_s20, %s16_s20   ;;  %s1619_s19 = sphi %s1658_s19, %s2174_s19   ;;  %s1615_s18 = sphi %s1656_s18, %s2173_s18  }
   0x3   : > { %p30_p1 = scmp.ge.s32.totalorder %s28_s21, 4  ;;  %p213_p2 = scmp.lt.s32.totalorder %s1623_s20, 5 }
   0x5   : > { %s2176_s21 = smov (%p30_p1, %s28_s21), 0  ;;  %p214_p3 = pnand %p1325_p0, %p213_p2 }
   0x6   : > { %p255_p4 = scmp.lt.s32.totalorder (!%p214_p3), %s1615_s18, 3  ;;  %p279_p5 = scmp.eq.s32.totalorder (!%p214_p3), %s1615_s18, 0 }
   0x7   : > { %217 = sbr.rel (%p214_p3) target bundleno = 388 (0x184), region = 32 }
   0xe   : > { %s2178_s18 = smov (!%p255_p4, %s1615_s18), 3  ;;  %284 = sbr.rel (!%p279_p5) target bundleno = 21 (0x15), region = 36 }
   0xf   : > { %s1400_s22 = sshll.u32 %s2178_s18, 9  ;;  %s1401_s23 = sshll.u32 %s2178_s18, 4  ;;  %v1625_v0 = vmov (%p279_p5), 0.0  }
  0x10   : > { %s1677_s26 = scalar_lea.vmem %s2167_s0, %s1400_s22  ;;  %s268_s29 = scalar_lea.vmem %s2168_s1, %s1401_s23  ;;  %285 = vst [vmem:[%s2171_s4] sm:$0x1] (%p279_p5), %v1625_v0  ;;  %286 = vst [vmem:[%s2172_s5] sm:$0x1] (%p279_p5), %v1625_v0 }
  0x11   : > { %s1685_s7 = scalar_lea.vmem %s2170_s3, %s1400_s22 }
  0x15 PF: > { %v351_v1 = vld [vmem:[%s268_s29] sm:$0xff]  ;;  %v352_v2 = vld [vmem:[%s268_s29 + $0x8] sm:$0xff]  ;;  %vm360_vm0 = vcmask 130048   ;;  %v289_v6 = vld [vmem:[%s1677_s26 + $0x10] sm:$0xff] }
  0x16   : > { %v287_v3 = vld [vmem:[%s1677_s26] sm:$0xff]  ;;  %v1570_v4 = vpack.c.bf16 %v352_v2, %v351_v1  ;;  %v288_v5 = vld [vmem:[%s1677_s26 + $0x8] sm:$0xff]  ;;  %v290_v7 = vld [vmem:[%s1677_s26 + $0x18] sm:$0xff] }
  0x17   : > { %1474 = vmatprep.mubr.msk.f32.mxu0 %vm360_vm0, %v287_v3  ;;  %v291_v8 = vld [vmem:[%s1677_s26 + $0x20] sm:$0xff]  ;;  %v320_v10 = vld [vmem:[%s1677_s26 + $0x108] sm:$0xff]  ;;  %v321_v12 = vld [vmem:[%s1677_s26 + $0x110] sm:$0xff] }
  0x18   : > { %1571 = vmatprep.subr.bf16.mxu0 %v1570_v4  ;;  %1574 = vmatprep.subr.bf16.mxu1 %v1570_v4  ;;  %v319_v9 = vld [vmem:[%s1677_s26 + $0x100] sm:$0xff]  ;;  %v292_v11 = vld [vmem:[%s1677_s26 + $0x28] sm:$0xff]  ;;  %v293_v13 = vld [vmem:[%s1677_s26 + $0x30] sm:$0xff] }
  0x19   : > { %1573 = vmatpush3.bf16.msra.mxu0 %v1570_v4  ;;  %1575 = vmatpush3.bf16.msra.mxu1 %v1570_v4  ;;  %v322_v14 = vld [vmem:[%s1677_s26 + $0x118] sm:$0xff]  ;;  %v323_v15 = vld [vmem:[%s1677_s26 + $0x120] sm:$0xff]  ;;  %v324_v18 = vld [vmem:[%s1677_s26 + $0x128] sm:$0xff] }
  0x1a   : > { %1522 = vmatprep.mubr.msk.f32.mxu1 %vm360_vm0, %v319_v9  ;;  %v294_v16 = vld [vmem:[%s1677_s26 + $0x38] sm:$0xff]  ;;  %v295_v17 = vld [vmem:[%s1677_s26 + $0x40] sm:$0xff]  ;;  %v325_v19 = vld [vmem:[%s1677_s26 + $0x130] sm:$0xff] }
  0x1b   : > { %v296_v20 = vld [vmem:[%s1677_s26 + $0x48] sm:$0xff]  ;;  %v297_v21 = vld [vmem:[%s1677_s26 + $0x50] sm:$0xff]  ;;  %v326_v22 = vld [vmem:[%s1677_s26 + $0x138] sm:$0xff] }
  0x1c   : > { %1475 = vmatmul.mubr.msk.f32.vlgmr.msra.gmra.mrb[0].mxu0 %vm360_vm0, %v288_v5  ;;  %1523 = vmatmul.mubr.msk.f32.vlgmr.msra.gmra.mrb[0].mxu1 %vm360_vm0, %v320_v10  ;;  %v327_v23 = vld [vmem:[%s1677_s26 + $0x140] sm:$0xff]  ;;  %v298_v24 = vld [vmem:[%s1677_s26 + $0x58] sm:$0xff]  ;;  %v328_v26 = vld [vmem:[%s1677_s26 + $0x148] sm:$0xff] }
  0x1d   : > { %1477 = vmatprep.mubr.msk.f32.mxu0 %vm360_vm0, %v289_v6  ;;  %1525 = vmatprep.mubr.msk.f32.mxu1 %vm360_vm0, %v321_v12  ;;  %v299_v25 = vld [vmem:[%s1677_s26 + $0x60] sm:$0xff]  ;;  %v329_v27 = vld [vmem:[%s1677_s26 + $0x150] sm:$0xff]  ;;  %v300_v28 = vld [vmem:[%s1677_s26 + $0x68] sm:$0xff] }
  0x1e   : > { %v301_v29 = vld [vmem:[%s1677_s26 + $0x70] sm:$0xff]  ;;  %v330_v30 = vld [vmem:[%s1677_s26 + $0x158] sm:$0xff]  ;;  %v331_v31 = vld [vmem:[%s1677_s26 + $0x160] sm:$0xff] }
  0x1f   : > { %v302_v32 = vld [vmem:[%s1677_s26 + $0x78] sm:$0xff]  ;;  %v303_v33 = vld [vmem:[%s1677_s26 + $0x80] sm:$0xff]  ;;  %v332_v34 = vld [vmem:[%s1677_s26 + $0x168] sm:$0xff] }
  0x20   : > { %1478 = vmatmul.mubr.msk.f32.gmra.mrb[2].mxu0 %vm360_vm0, %v290_v7  ;;  %1526 = vmatmul.mubr.msk.f32.gmra.mrb[2].mxu1 %vm360_vm0, %v322_v14  ;;  %v333_v35 = vld [vmem:[%s1677_s26 + $0x170] sm:$0xff]  ;;  %v304_v36 = vld [vmem:[%s1677_s26 + $0x88] sm:$0xff]  ;;  %v334_v38 = vld [vmem:[%s1677_s26 + $0x178] sm:$0xff] }
  0x21   : > { %1480 = vmatprep.mubr.msk.f32.mxu0 %vm360_vm0, %v291_v8  ;;  %1528 = vmatprep.mubr.msk.f32.mxu1 %vm360_vm0, %v323_v15  ;;  %v305_v37 = vld [vmem:[%s1677_s26 + $0x90] sm:$0xff]  ;;  %v335_v39 = vld [vmem:[%s1677_s26 + $0x180] sm:$0xff]  ;;  %v306_v40 = vld [vmem:[%s1677_s26 + $0x98] sm:$0xff] }
  0x22   : > { %v307_v41 = vld [vmem:[%s1677_s26 + $0xa0] sm:$0xff]  ;;  %v336_v42 = vld [vmem:[%s1677_s26 + $0x188] sm:$0xff]  ;;  %v337_v43 = vld [vmem:[%s1677_s26 + $0x190] sm:$0xff] }
  0x23   : > { %v308_v44 = vld [vmem:[%s1677_s26 + $0xa8] sm:$0xff]  ;;  %v309_v45 = vld [vmem:[%s1677_s26 + $0xb0] sm:$0xff]  ;;  %v338_v46 = vld [vmem:[%s1677_s26 + $0x198] sm:$0xff] }
  0x24   : > { %1481 = vmatmul.mubr.msk.f32.gmra.mrb[4].mxu0 %vm360_vm0, %v292_v11  ;;  %1529 = vmatmul.mubr.msk.f32.gmra.mrb[4].mxu1 %vm360_vm0, %v324_v18  ;;  %v339_v47 = vld [vmem:[%s1677_s26 + $0x1a0] sm:$0xff]  ;;  %v310_v48 = vld [vmem:[%s1677_s26 + $0xb8] sm:$0xff]  ;;  %v340_v50 = vld [vmem:[%s1677_s26 + $0x1a8] sm:$0xff] }
  0x25   : > { %1483 = vmatprep.mubr.msk.f32.mxu0 %vm360_vm0, %v293_v13  ;;  %1531 = vmatprep.mubr.msk.f32.mxu1 %vm360_vm0, %v325_v19  ;;  %v311_v49 = vld [vmem:[%s1677_s26 + $0xc0] sm:$0xff]  ;;  %v341_v51 = vld [vmem:[%s1677_s26 + $0x1b0] sm:$0xff]  ;;  %v312_v52 = vld [vmem:[%s1677_s26 + $0xc8] sm:$0xff] }
  0x26   : > { %v313_v53 = vld [vmem:[%s1677_s26 + $0xd0] sm:$0xff]  ;;  %v342_v54 = vld [vmem:[%s1677_s26 + $0x1b8] sm:$0xff]  ;;  %v343_v55 = vld [vmem:[%s1677_s26 + $0x1c0] sm:$0xff] }
  0x27   : > { %v314_v56 = vld [vmem:[%s1677_s26 + $0xd8] sm:$0xff]  ;;  %v315_v57 = vld [vmem:[%s1677_s26 + $0xe0] sm:$0xff]  ;;  %v344_v58 = vld [vmem:[%s1677_s26 + $0x1c8] sm:$0xff] }
  0x28   : > { %1484 = vmatmul.mubr.msk.f32.gmra.mrb[6].mxu0 %vm360_vm0, %v294_v16  ;;  %1532 = vmatmul.mubr.msk.f32.gmra.mrb[6].mxu1 %vm360_vm0, %v326_v22  ;;  %v345_v59 = vld [vmem:[%s1677_s26 + $0x1d0] sm:$0xff]  ;;  %v316_v60 = vld [vmem:[%s1677_s26 + $0xe8] sm:$0xff]  ;;  %v346_v62 = vld [vmem:[%s1677_s26 + $0x1d8] sm:$0xff] }
  0x29   : > { %1486 = vmatprep.mubr.msk.f32.mxu0 %vm360_vm0, %v295_v17  ;;  %1534 = vmatprep.mubr.msk.f32.mxu1 %vm360_vm0, %v327_v23  ;;  %v317_v61 = vld [vmem:[%s1677_s26 + $0xf0] sm:$0xff]  ;;  %v347_v63 = vld [vmem:[%s1677_s26 + $0x1e0] sm:$0xff]  ;;  %v318_v0 = vld [vmem:[%s1677_s26 + $0xf8] sm:$0xff] }
  0x2a   : > { %v348_v1 = vld [vmem:[%s1677_s26 + $0x1e8] sm:$0xff]  ;;  %v349_v2 = vld [vmem:[%s1677_s26 + $0x1f0] sm:$0xff]  ;;  %v350_v3 = vld [vmem:[%s1677_s26 + $0x1f8] sm:$0xff] }
  0x2b   : > { %v1824_v4 = vld [vmem:[%s2169_s2] ss:$0 sm:$0xff] }
  0x2c   : > { %1487 = vmatmul.mubr.msk.f32.gmra.mrb[8].mxu0 %vm360_vm0, %v296_v20  ;;  %1535 = vmatmul.mubr.msk.f32.gmra.mrb[8].mxu1 %vm360_vm0, %v328_v26 }
  0x2d   : > { %1489 = vmatprep.mubr.msk.f32.mxu0 %vm360_vm0, %v297_v21  ;;  %1537 = vmatprep.mubr.msk.f32.mxu1 %vm360_vm0, %v329_v27 }
  0x30   : > { %1490 = vmatmul.mubr.msk.f32.gmra.mrb[10].mxu0 %vm360_vm0, %v298_v24  ;;  %1538 = vmatmul.mubr.msk.f32.gmra.mrb[10].mxu1 %vm360_vm0, %v330_v30 }
  0x31   : > { %1492 = vmatprep.mubr.msk.f32.mxu0 %vm360_vm0, %v299_v25  ;;  %1540 = vmatprep.mubr.msk.f32.mxu1 %vm360_vm0, %v331_v31 }
  0x34   : > { %1493 = vmatmul.mubr.msk.f32.gmra.mrb[12].mxu0 %vm360_vm0, %v300_v28  ;;  %1541 = vmatmul.mubr.msk.f32.gmra.mrb[12].mxu1 %vm360_vm0, %v332_v34 }
  0x35   : > { %1495 = vmatprep.mubr.msk.f32.mxu0 %vm360_vm0, %v301_v29  ;;  %1543 = vmatprep.mubr.msk.f32.mxu1 %vm360_vm0, %v333_v35 }
  0x38   : > { %1496 = vmatmul.mubr.msk.f32.gmra.mrb[14].mxu0 %vm360_vm0, %v302_v32  ;;  %1544 = vmatmul.mubr.msk.f32.gmra.mrb[14].mxu1 %vm360_vm0, %v334_v38 }
  0x39   : > { %1498 = vmatprep.mubr.msk.f32.mxu0 %vm360_vm0, %v303_v33  ;;  %1546 = vmatprep.mubr.msk.f32.mxu1 %vm360_vm0, %v335_v39 }
  0x3c   : > { %1499 = vmatmul.mubr.msk.f32.gmra.mrb[16].mxu0 %vm360_vm0, %v304_v36  ;;  %1547 = vmatmul.mubr.msk.f32.gmra.mrb[16].mxu1 %vm360_vm0, %v336_v42 }
  0x3d   : > { %1501 = vmatprep.mubr.msk.f32.mxu0 %vm360_vm0, %v305_v37  ;;  %1549 = vmatprep.mubr.msk.f32.mxu1 %vm360_vm0, %v337_v43 }
  0x40   : > { %1502 = vmatmul.mubr.msk.f32.gmra.mrb[18].mxu0 %vm360_vm0, %v306_v40  ;;  %1550 = vmatmul.mubr.msk.f32.gmra.mrb[18].mxu1 %vm360_vm0, %v338_v46 }
  0x41   : > { %1504 = vmatprep.mubr.msk.f32.mxu0 %vm360_vm0, %v307_v41  ;;  %1552 = vmatprep.mubr.msk.f32.mxu1 %vm360_vm0, %v339_v47 }
  0x44   : > { %1505 = vmatmul.mubr.msk.f32.gmra.mrb[20].mxu0 %vm360_vm0, %v308_v44  ;;  %1553 = vmatmul.mubr.msk.f32.gmra.mrb[20].mxu1 %vm360_vm0, %v340_v50 }
  0x45   : > { %1507 = vmatprep.mubr.msk.f32.mxu0 %vm360_vm0, %v309_v45  ;;  %1555 = vmatprep.mubr.msk.f32.mxu1 %vm360_vm0, %v341_v51 }
  0x48   : > { %1508 = vmatmul.mubr.msk.f32.gmra.mrb[22].mxu0 %vm360_vm0, %v310_v48  ;;  %1556 = vmatmul.mubr.msk.f32.gmra.mrb[22].mxu1 %vm360_vm0, %v342_v54 }
  0x49   : > { %1510 = vmatprep.mubr.msk.f32.mxu0 %vm360_vm0, %v311_v49  ;;  %1558 = vmatprep.mubr.msk.f32.mxu1 %vm360_vm0, %v343_v55 }
  0x4c   : > { %1511 = vmatmul.mubr.msk.f32.gmra.mrb[24].mxu0 %vm360_vm0, %v312_v52  ;;  %1559 = vmatmul.mubr.msk.f32.gmra.mrb[24].mxu1 %vm360_vm0, %v344_v58 }
  0x4d   : > { %1513 = vmatprep.mubr.msk.f32.mxu0 %vm360_vm0, %v313_v53  ;;  %1561 = vmatprep.mubr.msk.f32.mxu1 %vm360_vm0, %v345_v59 }
  0x50   : > { %1514 = vmatmul.mubr.msk.f32.gmra.mrb[26].mxu0 %vm360_vm0, %v314_v56  ;;  %1562 = vmatmul.mubr.msk.f32.gmra.mrb[26].mxu1 %vm360_vm0, %v346_v62 }
  0x51   : > { %1516 = vmatprep.mubr.msk.f32.mxu0 %vm360_vm0, %v315_v57  ;;  %1564 = vmatprep.mubr.msk.f32.mxu1 %vm360_vm0, %v347_v63 }
  0x54   : > { %1517 = vmatmul.mubr.msk.f32.gmra.mrb[28].mxu0 %vm360_vm0, %v316_v60  ;;  %1565 = vmatmul.mubr.msk.f32.gmra.mrb[28].mxu1 %vm360_vm0, %v348_v1 }
  0x55   : > { %1519 = vmatprep.mubr.msk.f32.mxu0 %vm360_vm0, %v317_v61  ;;  %1567 = vmatprep.mubr.msk.f32.mxu1 %vm360_vm0, %v349_v2 }
  0x58   : > { %1520 = vmatmul.mubr.msk.f32.gmra.mrb[30].mxu0 %vm360_vm0, %v318_v0  ;;  %1568 = vmatmul.mubr.msk.f32.gmra.mrb[30].mxu1 %vm360_vm0, %v350_v3 }
  0xef   : > { %v1476_v5 = vpop.f32.mrb[0].mxu0  ;;  %v1524_v17 = vpop.f32.mrb[0].mxu1 }
  0xf0   : > { %v625_v6 = vadd.f32 %v1476_v5, %v1824_v4  ;;  %v619_v7 = vpop.f32.mrb[1].mxu0  ;;  %v1834_v18 = vadd.f32 %v1524_v17, %v1824_v4  ;;  %v779_v19 = vpop.f32.mrb[1].mxu1 }
  0xf1   : > { %v620_v8 = vadd.f32 %v1824_v4, %v619_v7  ;;  %v1838_v23 = vadd.f32 %v1824_v4, %v779_v19 }
  0xf2   : > { %939 = vst [vmem:[%s1685_s7 + $0x8] sm:$0xff] %v625_v6  ;;  %v1076_v9 = vmul.f32 %v625_v6, %v625_v6  ;;  %971 = vst [vmem:[%s1685_s7 + $0x108] sm:$0xff] %v1834_v18 }
  0xf3   : > { %938 = vst [vmem:[%s1685_s7] sm:$0xff] %v620_v8  ;;  %v1003_v10 = vadd.f32 %v625_v6, %v620_v8  ;;  %v1075_v11 = vmul.f32 %v620_v8, %v620_v8  ;;  %v1479_v12 = vpop.f32.mrb[2].mxu0  ;;  %970 = vst [vmem:[%s1685_s7 + $0x100] sm:$0xff] %v1838_v23  ;;  %v1527_v30 = vpop.f32.mrb[2].mxu1 }
  0xf4   : > { %v635_v13 = vadd.f32 %v1479_v12, %v1824_v4  ;;  %v629_v14 = vpop.f32.mrb[3].mxu0  ;;  %v1848_v31 = vadd.f32 %v1527_v30, %v1824_v4  ;;  %v789_v32 = vpop.f32.mrb[3].mxu1 }
  0xf5   : > { %v1139_v15 = vadd.f32 %v1076_v9, %v1075_v11  ;;  %v630_v16 = vadd.f32 %v1824_v4, %v629_v14  ;;  %v1852_v37 = vadd.f32 %v1824_v4, %v789_v32 }
  0xf6   : > { %941 = vst [vmem:[%s1685_s7 + $0x18] sm:$0xff] %v635_v13  ;;  %v1078_v26 = vmul.f32 %v635_v13, %v635_v13  ;;  %973 = vst [vmem:[%s1685_s7 + $0x118] sm:$0xff] %v1848_v31 }
  0xf7   : > { %940 = vst [vmem:[%s1685_s7 + $0x10] sm:$0xff] %v630_v16  ;;  %v1004_v20 = vadd.f32 %v1003_v10, %v630_v16  ;;  %v1077_v21 = vmul.f32 %v630_v16, %v630_v16  ;;  %v1482_v22 = vpop.f32.mrb[4].mxu0  ;;  %972 = vst [vmem:[%s1685_s7 + $0x110] sm:$0xff] %v1852_v37  ;;  %v1530_v44 = vpop.f32.mrb[4].mxu1 }
  0xf8   : > { %v645_v24 = vadd.f32 %v1482_v22, %v1824_v4  ;;  %v639_v25 = vpop.f32.mrb[5].mxu0  ;;  %v1862_v45 = vadd.f32 %v1530_v44, %v1824_v4  ;;  %v799_v46 = vpop.f32.mrb[5].mxu1 }
  0xf9   : > { %v1140_v27 = vadd.f32 %v1139_v15, %v1077_v21  ;;  %v640_v28 = vadd.f32 %v1824_v4, %v639_v25  ;;  %v1005_v29 = vadd.f32 %v1004_v20, %v635_v13  ;;  %v1866_v51 = vadd.f32 %v1824_v4, %v799_v46 }
  0xfa   : > { %943 = vst [vmem:[%s1685_s7 + $0x28] sm:$0xff] %v645_v24  ;;  %v1080_v40 = vmul.f32 %v645_v24, %v645_v24  ;;  %975 = vst [vmem:[%s1685_s7 + $0x128] sm:$0xff] %v1862_v45 }
  0xfb   : > { %942 = vst [vmem:[%s1685_s7 + $0x20] sm:$0xff] %v640_v28  ;;  %v1006_v33 = vadd.f32 %v1005_v29, %v640_v28  ;;  %v1079_v34 = vmul.f32 %v640_v28, %v640_v28  ;;  %v1141_v35 = vadd.f32 %v1140_v27, %v1078_v26  ;;  %v1485_v36 = vpop.f32.mrb[6].mxu0  ;;  %974 = vst [vmem:[%s1685_s7 + $0x120] sm:$0xff] %v1866_v51  ;;  %v1533_v58 = vpop.f32.mrb[6].mxu1 }
  0xfc   : > { %v655_v38 = vadd.f32 %v1485_v36, %v1824_v4  ;;  %v649_v39 = vpop.f32.mrb[7].mxu0  ;;  %v1876_v59 = vadd.f32 %v1533_v58, %v1824_v4  ;;  %v809_v60 = vpop.f32.mrb[7].mxu1 }
  0xfd   : > { %v1142_v41 = vadd.f32 %v1141_v35, %v1079_v34  ;;  %v650_v42 = vadd.f32 %v1824_v4, %v649_v39  ;;  %v1007_v43 = vadd.f32 %v1006_v33, %v645_v24  ;;  %v1880_v1 = vadd.f32 %v1824_v4, %v809_v60 }
  0xfe   : > { %945 = vst [vmem:[%s1685_s7 + $0x38] sm:$0xff] %v655_v38  ;;  %v1082_v54 = vmul.f32 %v655_v38, %v655_v38  ;;  %977 = vst [vmem:[%s1685_s7 + $0x138] sm:$0xff] %v1876_v59 }
  0xff   : > { %944 = vst [vmem:[%s1685_s7 + $0x30] sm:$0xff] %v650_v42  ;;  %v1008_v47 = vadd.f32 %v1007_v43, %v650_v42  ;;  %v1081_v48 = vmul.f32 %v650_v42, %v650_v42  ;;  %v1143_v49 = vadd.f32 %v1142_v41, %v1080_v40  ;;  %v1488_v50 = vpop.f32.mrb[8].mxu0  ;;  %976 = vst [vmem:[%s1685_s7 + $0x130] sm:$0xff] %v1880_v1  ;;  %v1536_v9 = vpop.f32.mrb[8].mxu1 }
 0x100   : > { %v665_v52 = vadd.f32 %v1488_v50, %v1824_v4  ;;  %v659_v53 = vpop.f32.mrb[9].mxu0  ;;  %v1890_v10 = vadd.f32 %v1536_v9, %v1824_v4  ;;  %v819_v11 = vpop.f32.mrb[9].mxu1 }
 0x101   : > { %v1144_v55 = vadd.f32 %v1143_v49, %v1081_v48  ;;  %v660_v56 = vadd.f32 %v1824_v4, %v659_v53  ;;  %v1009_v57 = vadd.f32 %v1008_v47, %v655_v38  ;;  %v1894_v16 = vadd.f32 %v1824_v4, %v819_v11 }
 0x102   : > { %947 = vst [vmem:[%s1685_s7 + $0x48] sm:$0xff] %v665_v52  ;;  %v1084_v5 = vmul.f32 %v665_v52, %v665_v52  ;;  %979 = vst [vmem:[%s1685_s7 + $0x148] sm:$0xff] %v1890_v10 }
 0x103   : > { %946 = vst [vmem:[%s1685_s7 + $0x40] sm:$0xff] %v660_v56  ;;  %v1010_v61 = vadd.f32 %v1009_v57, %v660_v56  ;;  %v1083_v62 = vmul.f32 %v660_v56, %v660_v56  ;;  %v1145_v63 = vadd.f32 %v1144_v55, %v1082_v54  ;;  %v1491_v0 = vpop.f32.mrb[10].mxu0  ;;  %978 = vst [vmem:[%s1685_s7 + $0x140] sm:$0xff] %v1894_v16  ;;  %v1539_v25 = vpop.f32.mrb[10].mxu1 }
 0x104   : > { %v675_v2 = vadd.f32 %v1491_v0, %v1824_v4  ;;  %v669_v3 = vpop.f32.mrb[11].mxu0  ;;  %v1904_v26 = vadd.f32 %v1539_v25, %v1824_v4  ;;  %v829_v27 = vpop.f32.mrb[11].mxu1 }
 0x105   : > { %v1146_v6 = vadd.f32 %v1145_v63, %v1083_v62  ;;  %v670_v7 = vadd.f32 %v1824_v4, %v669_v3  ;;  %v1011_v8 = vadd.f32 %v1010_v61, %v665_v52  ;;  %v1908_v33 = vadd.f32 %v1824_v4, %v829_v27 }
 0x106   : > { %949 = vst [vmem:[%s1685_s7 + $0x58] sm:$0xff] %v675_v2  ;;  %v1086_v20 = vmul.f32 %v675_v2, %v675_v2  ;;  %981 = vst [vmem:[%s1685_s7 + $0x158] sm:$0xff] %v1904_v26 }
 0x107   : > { %948 = vst [vmem:[%s1685_s7 + $0x50] sm:$0xff] %v670_v7  ;;  %v1012_v12 = vadd.f32 %v1011_v8, %v670_v7  ;;  %v1085_v13 = vmul.f32 %v670_v7, %v670_v7  ;;  %v1147_v14 = vadd.f32 %v1146_v6, %v1084_v5  ;;  %v1494_v15 = vpop.f32.mrb[12].mxu0  ;;  %980 = vst [vmem:[%s1685_s7 + $0x150] sm:$0xff] %v1908_v33  ;;  %v1542_v41 = vpop.f32.mrb[12].mxu1 }
 0x108   : > { %v685_v17 = vadd.f32 %v1494_v15, %v1824_v4  ;;  %v679_v19 = vpop.f32.mrb[13].mxu0  ;;  %v1918_v42 = vadd.f32 %v1542_v41, %v1824_v4  ;;  %v839_v43 = vpop.f32.mrb[13].mxu1 }
 0x109   : > { %v1148_v21 = vadd.f32 %v1147_v14, %v1085_v13  ;;  %v680_v22 = vadd.f32 %v1824_v4, %v679_v19  ;;  %v1013_v24 = vadd.f32 %v1012_v12, %v675_v2  ;;  %v1922_v49 = vadd.f32 %v1824_v4, %v839_v43 }
 0x10a   : > { %951 = vst [vmem:[%s1685_s7 + $0x68] sm:$0xff] %v685_v17  ;;  %v1088_v36 = vmul.f32 %v685_v17, %v685_v17  ;;  %983 = vst [vmem:[%s1685_s7 + $0x168] sm:$0xff] %v1918_v42 }
 0x10b   : > { %950 = vst [vmem:[%s1685_s7 + $0x60] sm:$0xff] %v680_v22  ;;  %v1014_v28 = vadd.f32 %v1013_v24, %v680_v22  ;;  %v1087_v29 = vmul.f32 %v680_v22, %v680_v22  ;;  %v1149_v30 = vadd.f32 %v1148_v21, %v1086_v20  ;;  %v1497_v32 = vpop.f32.mrb[14].mxu0  ;;  %982 = vst [vmem:[%s1685_s7 + $0x160] sm:$0xff] %v1922_v49  ;;  %v1545_v57 = vpop.f32.mrb[14].mxu1 }
 0x10c   : > { %v695_v34 = vadd.f32 %v1497_v32, %v1824_v4  ;;  %v689_v35 = vpop.f32.mrb[15].mxu0  ;;  %v1932_v58 = vadd.f32 %v1545_v57, %v1824_v4  ;;  %v849_v60 = vpop.f32.mrb[15].mxu1 }
 0x10d   : > { %v1150_v38 = vadd.f32 %v1149_v30, %v1087_v29  ;;  %v690_v39 = vadd.f32 %v1824_v4, %v689_v35  ;;  %v1015_v40 = vadd.f32 %v1014_v28, %v685_v17  ;;  %v1936_v2 = vadd.f32 %v1824_v4, %v849_v60 }
 0x10e   : > { %953 = vst [vmem:[%s1685_s7 + $0x78] sm:$0xff] %v695_v34  ;;  %v1090_v53 = vmul.f32 %v695_v34, %v695_v34  ;;  %985 = vst [vmem:[%s1685_s7 + $0x178] sm:$0xff] %v1932_v58 }
 0x10f   : > { %952 = vst [vmem:[%s1685_s7 + $0x70] sm:$0xff] %v690_v39  ;;  %v1016_v44 = vadd.f32 %v1015_v40, %v690_v39  ;;  %v1089_v46 = vmul.f32 %v690_v39, %v690_v39  ;;  %v1151_v47 = vadd.f32 %v1150_v38, %v1088_v36  ;;  %v1500_v48 = vpop.f32.mrb[16].mxu0  ;;  %984 = vst [vmem:[%s1685_s7 + $0x170] sm:$0xff] %v1936_v2  ;;  %v1548_v11 = vpop.f32.mrb[16].mxu1 }
 0x110   : > { %v705_v50 = vadd.f32 %v1500_v48, %v1824_v4  ;;  %v699_v52 = vpop.f32.mrb[17].mxu0  ;;  %v1946_v12 = vadd.f32 %v1548_v11, %v1824_v4  ;;  %v859_v13 = vpop.f32.mrb[17].mxu1 }
 0x111   : > { %v1152_v54 = vadd.f32 %v1151_v47, %v1089_v46  ;;  %v700_v55 = vadd.f32 %v1824_v4, %v699_v52  ;;  %v1017_v56 = vadd.f32 %v1016_v44, %v695_v34  ;;  %v1950_v20 = vadd.f32 %v1824_v4, %v859_v13 }
 0x112   : > { %955 = vst [vmem:[%s1685_s7 + $0x88] sm:$0xff] %v705_v50  ;;  %v1092_v6 = vmul.f32 %v705_v50, %v705_v50  ;;  %987 = vst [vmem:[%s1685_s7 + $0x188] sm:$0xff] %v1946_v12 }
 0x113   : > { %954 = vst [vmem:[%s1685_s7 + $0x80] sm:$0xff] %v700_v55  ;;  %v1018_v61 = vadd.f32 %v1017_v56, %v700_v55  ;;  %v1091_v62 = vmul.f32 %v700_v55, %v700_v55  ;;  %v1153_v63 = vadd.f32 %v1152_v54, %v1090_v53  ;;  %v1503_v0 = vpop.f32.mrb[18].mxu0  ;;  %986 = vst [vmem:[%s1685_s7 + $0x180] sm:$0xff] %v1950_v20  ;;  %v1551_v29 = vpop.f32.mrb[18].mxu1 }
 0x114   : > { %v715_v3 = vadd.f32 %v1503_v0, %v1824_v4  ;;  %v709_v5 = vpop.f32.mrb[19].mxu0  ;;  %v1960_v30 = vadd.f32 %v1551_v29, %v1824_v4  ;;  %v869_v32 = vpop.f32.mrb[19].mxu1 }
 0x115   : > { %v1154_v7 = vadd.f32 %v1153_v63, %v1091_v62  ;;  %v710_v8 = vadd.f32 %v1824_v4, %v709_v5  ;;  %v1019_v9 = vadd.f32 %v1018_v61, %v705_v50  ;;  %v1964_v39 = vadd.f32 %v1824_v4, %v869_v32 }
 0x116   : > { %957 = vst [vmem:[%s1685_s7 + $0x98] sm:$0xff] %v715_v3  ;;  %v1094_v24 = vmul.f32 %v715_v3, %v715_v3  ;;  %989 = vst [vmem:[%s1685_s7 + $0x198] sm:$0xff] %v1960_v30 }
 0x117   : > { %956 = vst [vmem:[%s1685_s7 + $0x90] sm:$0xff] %v710_v8  ;;  %v1020_v14 = vadd.f32 %v1019_v9, %v710_v8  ;;  %v1093_v15 = vmul.f32 %v710_v8, %v710_v8  ;;  %v1155_v17 = vadd.f32 %v1154_v7, %v1092_v6  ;;  %v1506_v19 = vpop.f32.mrb[20].mxu0  ;;  %988 = vst [vmem:[%s1685_s7 + $0x190] sm:$0xff] %v1964_v39  ;;  %v1554_v48 = vpop.f32.mrb[20].mxu1 }
 0x118   : > { %v725_v21 = vadd.f32 %v1506_v19, %v1824_v4  ;;  %v719_v22 = vpop.f32.mrb[21].mxu0  ;;  %v1974_v50 = vadd.f32 %v1554_v48, %v1824_v4  ;;  %v879_v52 = vpop.f32.mrb[21].mxu1 }
 0x119   : > { %v1156_v25 = vadd.f32 %v1155_v17, %v1093_v15  ;;  %v720_v27 = vadd.f32 %v1824_v4, %v719_v22  ;;  %v1021_v28 = vadd.f32 %v1020_v14, %v715_v3  ;;  %v1978_v57 = vadd.f32 %v1824_v4, %v879_v52 }
 0x11a   : > { %959 = vst [vmem:[%s1685_s7 + $0xa8] sm:$0xff] %v725_v21  ;;  %v1096_v43 = vmul.f32 %v725_v21, %v725_v21  ;;  %991 = vst [vmem:[%s1685_s7 + $0x1a8] sm:$0xff] %v1974_v50 }
 0x11b   : > { %958 = vst [vmem:[%s1685_s7 + $0xa0] sm:$0xff] %v720_v27  ;;  %v1022_v34 = vadd.f32 %v1021_v28, %v720_v27  ;;  %v1095_v35 = vmul.f32 %v720_v27, %v720_v27  ;;  %v1157_v36 = vadd.f32 %v1156_v25, %v1094_v24  ;;  %v1509_v38 = vpop.f32.mrb[22].mxu0  ;;  %990 = vst [vmem:[%s1685_s7 + $0x1a0] sm:$0xff] %v1978_v57  ;;  %v1557_v5 = vpop.f32.mrb[22].mxu1 }
 0x11c   : > { %v735_v40 = vadd.f32 %v1509_v38, %v1824_v4  ;;  %v729_v41 = vpop.f32.mrb[23].mxu0  ;;  %v1988_v6 = vadd.f32 %v1557_v5, %v1824_v4  ;;  %v889_v7 = vpop.f32.mrb[23].mxu1 }
 0x11d   : > { %v1158_v44 = vadd.f32 %v1157_v36, %v1095_v35  ;;  %v730_v46 = vadd.f32 %v1824_v4, %v729_v41  ;;  %v1023_v47 = vadd.f32 %v1022_v34, %v725_v21  ;;  %v1992_v14 = vadd.f32 %v1824_v4, %v889_v7 }
 0x11e   : > { %961 = vst [vmem:[%s1685_s7 + $0xb8] sm:$0xff] %v735_v40  ;;  %v1098_v62 = vmul.f32 %v735_v40, %v735_v40  ;;  %993 = vst [vmem:[%s1685_s7 + $0x1b8] sm:$0xff] %v1988_v6 }
 0x11f   : > { %960 = vst [vmem:[%s1685_s7 + $0xb0] sm:$0xff] %v730_v46  ;;  %v1024_v53 = vadd.f32 %v1023_v47, %v730_v46  ;;  %v1097_v54 = vmul.f32 %v730_v46, %v730_v46  ;;  %v1159_v55 = vadd.f32 %v1158_v44, %v1096_v43  ;;  %v1512_v56 = vpop.f32.mrb[24].mxu0  ;;  %992 = vst [vmem:[%s1685_s7 + $0x1b0] sm:$0xff] %v1992_v14  ;;  %v1560_v25 = vpop.f32.mrb[24].mxu1 }
 0x120   : > { %v745_v60 = vadd.f32 %v1512_v56, %v1824_v4  ;;  %v739_v61 = vpop.f32.mrb[25].mxu0  ;;  %v2002_v27 = vadd.f32 %v1560_v25, %v1824_v4  ;;  %v899_v28 = vpop.f32.mrb[25].mxu1 }
 0x121   : > { %v1160_v63 = vadd.f32 %v1159_v55, %v1097_v54  ;;  %v740_v0 = vadd.f32 %v1824_v4, %v739_v61  ;;  %v1025_v3 = vadd.f32 %v1024_v53, %v735_v40  ;;  %v2006_v36 = vadd.f32 %v1824_v4, %v899_v28 }
 0x122   : > { %963 = vst [vmem:[%s1685_s7 + $0xc8] sm:$0xff] %v745_v60  ;;  %v1100_v19 = vmul.f32 %v745_v60, %v745_v60  ;;  %995 = vst [vmem:[%s1685_s7 + $0x1c8] sm:$0xff] %v2002_v27 }
 0x123   : > { %962 = vst [vmem:[%s1685_s7 + $0xc0] sm:$0xff] %v740_v0  ;;  %v1026_v8 = vadd.f32 %v1025_v3, %v740_v0  ;;  %v1099_v9 = vmul.f32 %v740_v0, %v740_v0  ;;  %v1161_v11 = vadd.f32 %v1160_v63, %v1098_v62  ;;  %v1515_v13 = vpop.f32.mrb[26].mxu0  ;;  %994 = vst [vmem:[%s1685_s7 + $0x1c0] sm:$0xff] %v2006_v36  ;;  %v1563_v47 = vpop.f32.mrb[26].mxu1 }
 0x124   : > { %v755_v15 = vadd.f32 %v1515_v13, %v1824_v4  ;;  %v749_v17 = vpop.f32.mrb[27].mxu0  ;;  %v2016_v48 = vadd.f32 %v1563_v47, %v1824_v4  ;;  %v909_v52 = vpop.f32.mrb[27].mxu1 }
 0x125   : > { %v1162_v21 = vadd.f32 %v1161_v11, %v1099_v9  ;;  %v750_v22 = vadd.f32 %v1824_v4, %v749_v17  ;;  %v1027_v24 = vadd.f32 %v1026_v8, %v745_v60  ;;  %v2020_v60 = vadd.f32 %v1824_v4, %v909_v52 }
 0x126   : > { %965 = vst [vmem:[%s1685_s7 + $0xd8] sm:$0xff] %v755_v15  ;;  %v1102_v41 = vmul.f32 %v755_v15, %v755_v15  ;;  %997 = vst [vmem:[%s1685_s7 + $0x1d8] sm:$0xff] %v2016_v48  ;;  %v1111_v52 = vmul.f32 %v1866_v51, %v1866_v51 }
 0x127   : > { %964 = vst [vmem:[%s1685_s7 + $0xd0] sm:$0xff] %v750_v22  ;;  %v1028_v29 = vadd.f32 %v1027_v24, %v750_v22  ;;  %v1101_v32 = vmul.f32 %v750_v22, %v750_v22  ;;  %v1163_v34 = vadd.f32 %v1162_v21, %v1100_v19  ;;  %v1518_v35 = vpop.f32.mrb[28].mxu0  ;;  %996 = vst [vmem:[%s1685_s7 + $0x1d0] sm:$0xff] %v2020_v60  ;;  %v1566_v7 = vpop.f32.mrb[28].mxu1 }
 0x128   : > { %v765_v38 = vadd.f32 %v1518_v35, %v1824_v4  ;;  %v759_v40 = vpop.f32.mrb[29].mxu0  ;;  %v2030_v8 = vadd.f32 %v1566_v7, %v1824_v4  ;;  %v919_v9 = vpop.f32.mrb[29].mxu1  ;;  %v1107_v24 = vmul.f32 %v1838_v23, %v1838_v23 }
 0x129   : > { %v1164_v43 = vadd.f32 %v1163_v34, %v1101_v32  ;;  %v760_v44 = vadd.f32 %v1824_v4, %v759_v40  ;;  %v1029_v46 = vadd.f32 %v1028_v29, %v755_v15  ;;  %v2034_v17 = vadd.f32 %v1824_v4, %v919_v9 }
 0x12a   : > { %967 = vst [vmem:[%s1685_s7 + $0xe8] sm:$0xff] %v765_v38  ;;  %v1104_v63 = vmul.f32 %v765_v38, %v765_v38  ;;  %999 = vst [vmem:[%s1685_s7 + $0x1e8] sm:$0xff] %v2030_v8 }
 0x12b   : > { %966 = vst [vmem:[%s1685_s7 + $0xe0] sm:$0xff] %v760_v44  ;;  %v1030_v53 = vadd.f32 %v1029_v46, %v760_v44  ;;  %v1103_v54 = vmul.f32 %v760_v44, %v760_v44  ;;  %v1165_v55 = vadd.f32 %v1164_v43, %v1102_v41  ;;  %v1521_v56 = vpop.f32.mrb[30].mxu0  ;;  %998 = vst [vmem:[%s1685_s7 + $0x1e0] sm:$0xff] %v2034_v17  ;;  %v1569_v25 = vpop.f32.mrb[30].mxu1 }
 0x12c   : > { %v775_v61 = vadd.f32 %v1521_v56, %v1824_v4  ;;  %v769_v62 = vpop.f32.mrb[31].mxu0  ;;  %v2043_v28 = vadd.f32 %v1569_v25, %v1824_v4  ;;  %v929_v29 = vpop.f32.mrb[31].mxu1  ;;  %v1109_v43 = vmul.f32 %v1852_v37, %v1852_v37 }
 0x12d   : > { %v1166_v0 = vadd.f32 %v1165_v55, %v1103_v54  ;;  %v770_v3 = vadd.f32 %v1824_v4, %v769_v62  ;;  %v1031_v5 = vadd.f32 %v1030_v53, %v765_v38  ;;  %v2047_v35 = vadd.f32 %v1824_v4, %v929_v29 }
 0x12e   : > { %969 = vst [vmem:[%s1685_s7 + $0xf8] sm:$0xff] %v775_v61  ;;  %v1106_v19 = vmul.f32 %v775_v61, %v775_v61  ;;  %1001 = vst [vmem:[%s1685_s7 + $0x1f8] sm:$0xff] %v2043_v28  ;;  %v1108_v38 = vmul.f32 %v1834_v18, %v1834_v18  ;;  %v1110_v4 = vmul.f32 %v1848_v31, %v1848_v31 }
 0x12f   : > { %968 = vst [vmem:[%s1685_s7 + $0xf0] sm:$0xff] %v770_v3  ;;  %v1032_v11 = vadd.f32 %v1031_v5, %v770_v3  ;;  %v1105_v13 = vmul.f32 %v770_v3, %v770_v3  ;;  %v1167_v15 = vadd.f32 %v1166_v0, %v1104_v63  ;;  %1000 = vst [vmem:[%s1685_s7 + $0x1f0] sm:$0xff] %v2047_v35 }
 0x130   : > { %v1112_v54 = vmul.f32 %v1862_v45, %v1862_v45 }
 0x131   : > { %v1168_v21 = vadd.f32 %v1167_v15, %v1105_v13  ;;  %v1033_v22 = vadd.f32 %v1032_v11, %v775_v61 }
 0x133   : > { %v1034_v32 = vadd.f32 %v1033_v22, %v1838_v23  ;;  %v1169_v34 = vadd.f32 %v1168_v21, %v1106_v19 }
 0x135   : > { %v1170_v40 = vadd.f32 %v1169_v34, %v1107_v24  ;;  %v1035_v41 = vadd.f32 %v1034_v32, %v1834_v18 }
 0x137   : > { %v1036_v44 = vadd.f32 %v1035_v41, %v1852_v37  ;;  %v1171_v23 = vadd.f32 %v1170_v40, %v1108_v38  ;;  %v1113_v37 = vmul.f32 %v1880_v1, %v1880_v1 }
 0x139   : > { %v1172_v46 = vadd.f32 %v1171_v23, %v1109_v43  ;;  %v1037_v47 = vadd.f32 %v1036_v44, %v1848_v31  ;;  %v1114_v31 = vmul.f32 %v1876_v59, %v1876_v59 }
 0x13b   : > { %v1038_v53 = vadd.f32 %v1037_v47, %v1866_v51  ;;  %v1173_v18 = vadd.f32 %v1172_v46, %v1110_v4  ;;  %v1115_v51 = vmul.f32 %v1894_v16, %v1894_v16 }
 0x13d   : > { %v1174_v55 = vadd.f32 %v1173_v18, %v1111_v52  ;;  %v1039_v56 = vadd.f32 %v1038_v53, %v1862_v45  ;;  %v1116_v45 = vmul.f32 %v1890_v10, %v1890_v10 }
 0x13f   : > { %v1040_v61 = vadd.f32 %v1039_v56, %v1880_v1  ;;  %v1175_v62 = vadd.f32 %v1174_v55, %v1112_v54  ;;  %v1117_v1 = vmul.f32 %v1908_v33, %v1908_v33 }
 0x141   : > { %v1176_v63 = vadd.f32 %v1175_v62, %v1113_v37  ;;  %v1041_v0 = vadd.f32 %v1040_v61, %v1876_v59  ;;  %v1118_v59 = vmul.f32 %v1904_v26, %v1904_v26 }
 0x143   : > { %v1042_v3 = vadd.f32 %v1041_v0, %v1894_v16  ;;  %v1177_v5 = vadd.f32 %v1176_v63, %v1114_v31  ;;  %v1119_v16 = vmul.f32 %v1922_v49, %v1922_v49 }
 0x145   : > { %v1178_v7 = vadd.f32 %v1177_v5, %v1115_v51  ;;  %v1043_v9 = vadd.f32 %v1042_v3, %v1890_v10  ;;  %v1120_v10 = vmul.f32 %v1918_v42, %v1918_v42 }
 0x147   : > { %v1044_v11 = vadd.f32 %v1043_v9, %v1908_v33  ;;  %v1179_v13 = vadd.f32 %v1178_v7, %v1116_v45  ;;  %v1121_v33 = vmul.f32 %v1936_v2, %v1936_v2 }
 0x149   : > { %v1180_v15 = vadd.f32 %v1179_v13, %v1117_v1  ;;  %v1045_v19 = vadd.f32 %v1044_v11, %v1904_v26  ;;  %v1122_v26 = vmul.f32 %v1932_v58, %v1932_v58 }
 0x14b   : > { %v1046_v21 = vadd.f32 %v1045_v19, %v1922_v49  ;;  %v1181_v22 = vadd.f32 %v1180_v15, %v1118_v59  ;;  %v1123_v49 = vmul.f32 %v1950_v20, %v1950_v20 }
 0x14d   : > { %v1182_v24 = vadd.f32 %v1181_v22, %v1119_v16  ;;  %v1047_v25 = vadd.f32 %v1046_v21, %v1918_v42  ;;  %v1124_v42 = vmul.f32 %v1946_v12, %v1946_v12 }
 0x14f   : > { %v1048_v29 = vadd.f32 %v1047_v25, %v1936_v2  ;;  %v1183_v32 = vadd.f32 %v1182_v24, %v1120_v10  ;;  %v1125_v2 = vmul.f32 %v1964_v39, %v1964_v39 }
 0x151   : > { %v1184_v34 = vadd.f32 %v1183_v32, %v1121_v33  ;;  %v1049_v38 = vadd.f32 %v1048_v29, %v1932_v58  ;;  %v1126_v58 = vmul.f32 %v1960_v30, %v1960_v30 }
 0x153   : > { %v1050_v40 = vadd.f32 %v1049_v38, %v1950_v20  ;;  %v1185_v41 = vadd.f32 %v1184_v34, %v1122_v26  ;;  %v1127_v20 = vmul.f32 %v1978_v57, %v1978_v57 }
 0x155   : > { %v1186_v43 = vadd.f32 %v1185_v41, %v1123_v49  ;;  %v1051_v44 = vadd.f32 %v1050_v40, %v1946_v12  ;;  %v1128_v12 = vmul.f32 %v1974_v50, %v1974_v50 }
 0x157   : > { %v1052_v23 = vadd.f32 %v1051_v44, %v1964_v39  ;;  %v1187_v4 = vadd.f32 %v1186_v43, %v1124_v42  ;;  %v1129_v39 = vmul.f32 %v1992_v14, %v1992_v14 }
 0x159   : > { %v1188_v46 = vadd.f32 %v1187_v4, %v1125_v2  ;;  %v1053_v47 = vadd.f32 %v1052_v23, %v1960_v30  ;;  %v1130_v30 = vmul.f32 %v1988_v6, %v1988_v6 }
 0x15b   : > { %v1054_v52 = vadd.f32 %v1053_v47, %v1978_v57  ;;  %v1189_v53 = vadd.f32 %v1188_v46, %v1126_v58  ;;  %v1131_v57 = vmul.f32 %v2006_v36, %v2006_v36 }
 0x15d   : > { %v1190_v18 = vadd.f32 %v1189_v53, %v1127_v20  ;;  %v1055_v54 = vadd.f32 %v1054_v52, %v1974_v50  ;;  %v1132_v50 = vmul.f32 %v2002_v27, %v2002_v27 }
 0x15f   : > { %v1056_v55 = vadd.f32 %v1055_v54, %v1992_v14  ;;  %v1191_v56 = vadd.f32 %v1190_v18, %v1128_v12  ;;  %v1133_v14 = vmul.f32 %v2020_v60, %v2020_v60 }
 0x161   : > { %v1192_v37 = vadd.f32 %v1191_v56, %v1129_v39  ;;  %v1057_v61 = vadd.f32 %v1056_v55, %v1988_v6  ;;  %v1134_v6 = vmul.f32 %v2016_v48, %v2016_v48 }
 0x163   : > { %v1058_v62 = vadd.f32 %v1057_v61, %v2006_v36  ;;  %v1193_v31 = vadd.f32 %v1192_v37, %v1130_v30  ;;  %v1135_v36 = vmul.f32 %v2034_v17, %v2034_v17 }
 0x165   : > { %v1194_v63 = vadd.f32 %v1193_v31, %v1131_v57  ;;  %v1059_v0 = vadd.f32 %v1058_v62, %v2002_v27  ;;  %v1136_v27 = vmul.f32 %v2030_v8, %v2030_v8 }
 0x167   : > { %v1060_v51 = vadd.f32 %v1059_v0, %v2020_v60  ;;  %v1195_v3 = vadd.f32 %v1194_v63, %v1132_v50  ;;  %v1137_v60 = vmul.f32 %v2047_v35, %v2047_v35 }
 0x169   : > { %v1196_v5 = vadd.f32 %v1195_v3, %v1133_v14  ;;  %v1061_v45 = vadd.f32 %v1060_v51, %v2016_v48  ;;  %v1138_v48 = vmul.f32 %v2043_v28, %v2043_v28 }
 0x16b   : > { %v1062_v7 = vadd.f32 %v1061_v45, %v2034_v17  ;;  %v1197_v9 = vadd.f32 %v1196_v5, %v1134_v6 }
 0x16d   : > { %v1198_v1 = vadd.f32 %v1197_v9, %v1135_v36  ;;  %v1063_v11 = vadd.f32 %v1062_v7, %v2030_v8 }
 0x16f   : > { %v1064_v13 = vadd.f32 %v1063_v11, %v2047_v35  ;;  %v1199_v59 = vadd.f32 %v1198_v1, %v1136_v27  ;;  %v1002_v35 = vld [vmem:[%s2171_s4] sm:$0x1] }
 0x171   : > { %v1065_v15 = vadd.f32 %v1064_v13, %v2043_v28  ;;  %v1200_v19 = vadd.f32 %v1199_v59, %v1137_v60  ;;  %v1074_v28 = vld [vmem:[%s2172_s5] sm:$0x1] }
 0x173   : > { %v1066_v17 = vrot.slane %v1065_v15, 4  ;;  %v1201_v16 = vadd.f32 %v1200_v19, %v1138_v48 }
 0x175   : > { %v1067_v21 = vadd.f32 %v1066_v17, %v1065_v15  ;;  %v1202_v22 = vrot.slane %v1201_v16, 4 }
 0x177   : > { %v1068_v10 = vrot.slane %v1067_v21, 2  ;;  %v1203_v24 = vadd.f32 %v1202_v22, %v1201_v16 }
 0x179   : > { %v1069_v25 = vadd.f32 %v1068_v10, %v1067_v21  ;;  %v1204_v8 = vrot.slane %v1203_v24, 2 }
 0x17b   : > { %v1070_v33 = vrot.slane %v1069_v25, 1  ;;  %v1205_v29 = vadd.f32 %v1204_v8, %v1203_v24 }
 0x17d   : > { %v1071_v32 = vadd.f32 %v1070_v33, %v1069_v25  ;;  %v1206_v26 = vrot.slane %v1205_v29, 1 }
 0x17f   : > { %v1072_v34 = vadd.f32 %v1071_v32, %v1002_v35  ;;  %v1207_v38 = vadd.f32 %v1206_v26, %v1205_v29 }
 0x181   : > { %1073 = vst [vmem:[%s2171_s4] sm:$0x1] %v1072_v34  ;;  %v1208_v49 = vadd.f32 %v1207_v38, %v1074_v28 }
 0x183   : > { %1209 = vst [vmem:[%s2172_s5] sm:$0x1] %v1208_v49 }
 0x184 PF: > { %s16_s20 = sadd.s32 1, %s1623_s20   ;;  %s2173_s18 = smov %s1619_s19 }
 0x185   : > { %p13_p6 = scmp.ge.s32.totalorder %s16_s20, 6   ;;  %s2174_s19 = smov %s2176_s21 }
 0x187   :  { %15 = sbr.rel (!%p13_p6) target bundleno = 2 (0x2), region = 85 }

// kernel: deconvlayer_forward.3
= control target key start
LH: loop header
LB: loop body
LE: loop exit
PB: predicated region body
PF: predicated region fallthrough
CT: control target
= control target key end

     0   :  { %s1229_s17 = smov 0   ;;  %s1915_s0 = inlined_call_operand.vmem [shape: f32[2048,128], index: 0, kind: input, shape index: {}]   ;;  %s1916_s1 = inlined_call_operand.vmem [shape: f32[1,128], index: 1, kind: input, shape index: {}]   ;;  %s1917_s2 = inlined_call_operand.vmem [shape: f32[1,128], index: 2, kind: input, shape index: {}]   ;;  %s1918_s3 = inlined_call_operand.<no memory space> [shape: f32[1], index: 3, kind: input, shape index: {}]   ;;  %s1919_s4 = inlined_call_operand.vmem [shape: f32[2048,128], index: 4, kind: output, shape index: {}]  }
   0x1   :  { %9 = sst [smem:[#allocation2]] %s1918_s3 }
   0x2 LB: > { %s1170_s18 = sadd.s32 4294967295, %s1199_s17   ;;  %p1174_p0 = scmp.ge.s32.totalorder %s1199_s17, 1  ;;  %s1199_s17 = sphi %s1229_s17, %s15_s17  }
   0x3   : > { %p164_p1 = scmp.lt.s32.totalorder %s1199_s17, 3 }
   0x5   : > { %p165_p2 = pnand %p1174_p0, %p164_p1 }
   0x6   : > { %s1175_s19 = sshll.u32 (!%p165_p2), %s1170_s18, 7  ;;  %s202_s20 = sld [smem:[#allocation2]] (!%p165_p2)  ;;  %v1243_v0 = vld [vmem:[%s1916_s1] ss:$0 sm:$0xff] (!%p165_p2) }
   0x7   : > { %168 = sbr.rel (%p165_p2) target bundleno = 183 (0xb7), region = 36  ;;  %p191_p3 = scmp.lt.s32.totalorder (!%p165_p2), %s1175_s19, 255  ;;  %v1253_v1 = vld [vmem:[%s1917_s2] ss:$0 sm:$0xff] (!%p165_p2) }
   0xc   : > { %v1264_v11 = vstv (!%p165_p2), %s202_s20 }
   0xe   : > { %s1921_s19 = smov (!%p191_p3, %s1175_s19), 255 }
   0xf   : > { %s1176_s3 = sshll.u32 %s1921_s19, 3 }
  0x10   : > { %s1248_s25 = scalar_lea.vmem %s1915_s0, %s1176_s3  ;;  %s1282_s30 = scalar_lea.vmem %s1919_s4, %s1176_s3 }
  0x11   : > { %v203_v2 = vld [vmem:[%s1248_s25] sm:$0xff]  ;;  %v204_v3 = vld [vmem:[%s1248_s25 + $0x8] sm:$0xff]  ;;  %v205_v4 = vld [vmem:[%s1248_s25 + $0x10] sm:$0xff] }
  0x12   : > { %v338_v5 = vmul.f32 %v1243_v0, %v203_v2  ;;  %v339_v6 = vmul.f32 %v1243_v0, %v204_v3  ;;  %v340_v7 = vmul.f32 %v1243_v0, %v205_v4  ;;  %v206_v8 = vld [vmem:[%s1248_s25 + $0x18] sm:$0xff]  ;;  %v207_v9 = vld [vmem:[%s1248_s25 + $0x20] sm:$0xff]  ;;  %v208_v10 = vld [vmem:[%s1248_s25 + $0x28] sm:$0xff] }
  0x13   : > { %v341_v12 = vmul.f32 %v1243_v0, %v206_v8  ;;  %v342_v13 = vmul.f32 %v1243_v0, %v207_v9  ;;  %v343_v14 = vmul.f32 %v1243_v0, %v208_v10  ;;  %v209_v15 = vld [vmem:[%s1248_s25 + $0x30] sm:$0xff]  ;;  %v210_v16 = vld [vmem:[%s1248_s25 + $0x38] sm:$0xff]  ;;  %v211_v29 = vld [vmem:[%s1248_s25 + $0x40] sm:$0xff] }
  0x14   : > { %v473_v17 = vadd.f32 %v1253_v1, %v338_v5  ;;  %v474_v18 = vadd.f32 %v1253_v1, %v339_v6  ;;  %v475_v19 = vadd.f32 %v1253_v1, %v340_v7  ;;  %v344_v20 = vmul.f32 %v1243_v0, %v209_v15  ;;  %v212_v33 = vld [vmem:[%s1248_s25 + $0x48] sm:$0xff]  ;;  %v213_v34 = vld [vmem:[%s1248_s25 + $0x50] sm:$0xff]  ;;  %v214_v35 = vld [vmem:[%s1248_s25 + $0x58] sm:$0xff] }
  0x15   : > { %v476_v21 = vadd.f32 %v1253_v1, %v341_v12  ;;  %v477_v22 = vadd.f32 %v1253_v1, %v342_v13  ;;  %v478_v23 = vadd.f32 %v1253_v1, %v343_v14  ;;  %v345_v24 = vmul.f32 %v1243_v0, %v210_v16  ;;  %v215_v47 = vld [vmem:[%s1248_s25 + $0x60] sm:$0xff]  ;;  %v216_v48 = vld [vmem:[%s1248_s25 + $0x68] sm:$0xff]  ;;  %v217_v61 = vld [vmem:[%s1248_s25 + $0x70] sm:$0xff] }
  0x16   : > { %vm601_vm0 = vcmp.ge.f32.partialorder %v473_v17, 0.0  ;;  %v730_v25 = vmul.f32 %v1264_v11, %v473_v17  ;;  %vm602_vm1 = vcmp.ge.f32.partialorder %v474_v18, 0.0  ;;  %v731_v26 = vmul.f32 %v1264_v11, %v474_v18  ;;  %v218_v62 = vld [vmem:[%s1248_s25 + $0x78] sm:$0xff]  ;;  %v219_v7 = vld [vmem:[%s1248_s25 + $0x80] sm:$0xff]  ;;  %v220_v8 = vld [vmem:[%s1248_s25 + $0x88] sm:$0xff] }
  0x17   : > { %vm603_vm2 = vcmp.ge.f32.partialorder %v475_v19, 0.0  ;;  %v732_v27 = vmul.f32 %v1264_v11, %v475_v19  ;;  %vm604_vm3 = vcmp.ge.f32.partialorder %v476_v21, 0.0  ;;  %v733_v28 = vmul.f32 %v1264_v11, %v476_v21  ;;  %v221_v14 = vld [vmem:[%s1248_s25 + $0x90] sm:$0xff]  ;;  %v222_v15 = vld [vmem:[%s1248_s25 + $0x98] sm:$0xff] }
  0x18   : > { %v858_v30 = vsel %vm601_vm0, %v473_v17, %v730_v25  ;;  %v859_v31 = vsel %vm602_vm1, %v474_v18, %v731_v26  ;;  %vm605_vm4 = vcmp.ge.f32.partialorder %v477_v22, 0.0  ;;  %v734_v32 = vmul.f32 %v1264_v11, %v477_v22  ;;  %v223_v26 = vld [vmem:[%s1248_s25 + $0xa0] sm:$0xff] }
  0x19   : > { %986 = vst [vmem:[%s1282_s30] sm:$0xff] %v858_v30  ;;  %987 = vst [vmem:[%s1282_s30 + $0x8] sm:$0xff] %v859_v31  ;;  %v860_v36 = vsel %vm603_vm2, %v475_v19, %v732_v27  ;;  %v861_v37 = vsel %vm604_vm3, %v476_v21, %v733_v28  ;;  %vm606_vm5 = vcmp.ge.f32.partialorder %v478_v23, 0.0  ;;  %v735_v38 = vmul.f32 %v1264_v11, %v478_v23  ;;  %v224_v27 = vld [vmem:[%s1248_s25 + $0xa8] sm:$0xff] }
  0x1a   : > { %988 = vst [vmem:[%s1282_s30 + $0x10] sm:$0xff] %v860_v36  ;;  %989 = vst [vmem:[%s1282_s30 + $0x18] sm:$0xff] %v861_v37  ;;  %v862_v39 = vsel %vm605_vm4, %v477_v22, %v734_v32  ;;  %v479_v40 = vadd.f32 %v1253_v1, %v344_v20  ;;  %v480_v41 = vadd.f32 %v1253_v1, %v345_v24 }
  0x1b   : > { %v346_v42 = vmul.f32 %v1243_v0, %v211_v29  ;;  %990 = vst [vmem:[%s1282_s30 + $0x20] sm:$0xff] %v862_v39  ;;  %v863_v43 = vsel %vm606_vm5, %v478_v23, %v735_v38  ;;  %v347_v44 = vmul.f32 %v1243_v0, %v212_v33  ;;  %v348_v45 = vmul.f32 %v1243_v0, %v213_v34 }
  0x1c   : > { %v349_v46 = vmul.f32 %v1243_v0, %v214_v35  ;;  %991 = vst [vmem:[%s1282_s30 + $0x28] sm:$0xff] %v863_v43  ;;  %vm607_vm6 = vcmp.ge.f32.partialorder %v479_v40, 0.0  ;;  %v736_v49 = vmul.f32 %v1264_v11, %v479_v40  ;;  %vm608_vm7 = vcmp.ge.f32.partialorder %v480_v41, 0.0 }
  0x1d   : > { %v737_v50 = vmul.f32 %v1264_v11, %v480_v41  ;;  %v481_v51 = vadd.f32 %v1253_v1, %v346_v42  ;;  %v482_v52 = vadd.f32 %v1253_v1, %v347_v44  ;;  %v483_v53 = vadd.f32 %v1253_v1, %v348_v45 }
  0x1e   : > { %v484_v54 = vadd.f32 %v1253_v1, %v349_v46  ;;  %v864_v55 = vsel %vm607_vm6, %v479_v40, %v736_v49  ;;  %v350_v57 = vmul.f32 %v1243_v0, %v215_v47  ;;  %v351_v58 = vmul.f32 %v1243_v0, %v216_v48  ;;  %v225_v40 = vld [vmem:[%s1248_s25 + $0xb0] sm:$0xff]  ;;  %v227_v48 = vld [vmem:[%s1248_s25 + $0xc0] sm:$0xff]  ;;  %v228_v49 = vld [vmem:[%s1248_s25 + $0xc8] sm:$0xff] }
  0x1f   : > { %v865_v56 = vsel %vm608_vm7, %v480_v41, %v737_v50  ;;  %992 = vst [vmem:[%s1282_s30 + $0x30] sm:$0xff] %v864_v55  ;;  %vm609_vm8 = vcmp.ge.f32.partialorder %v481_v51, 0.0  ;;  %v738_v59 = vmul.f32 %v1264_v11, %v481_v51  ;;  %vm610_vm9 = vcmp.ge.f32.partialorder %v482_v52, 0.0  ;;  %v226_v41 = vld [vmem:[%s1248_s25 + $0xb8] sm:$0xff] }
  0x20   : > { %993 = vst [vmem:[%s1282_s30 + $0x38] sm:$0xff] %v865_v56  ;;  %v739_v60 = vmul.f32 %v1264_v11, %v482_v52  ;;  %vm611_vm10 = vcmp.ge.f32.partialorder %v483_v53, 0.0  ;;  %v740_v63 = vmul.f32 %v1264_v11, %v483_v53  ;;  %vm612_vm11 = vcmp.ge.f32.partialorder %v484_v54, 0.0  ;;  %v230_v55 = vld [vmem:[%s1248_s25 + $0xd8] sm:$0xff] }
  0x21   : > { %v741_v2 = vmul.f32 %v1264_v11, %v484_v54  ;;  %v866_v3 = vsel %vm609_vm8, %v481_v51, %v738_v59  ;;  %v485_v5 = vadd.f32 %v1253_v1, %v350_v57  ;;  %v486_v6 = vadd.f32 %v1253_v1, %v351_v58 }
  0x22   : > { %v867_v4 = vsel %vm610_vm9, %v482_v52, %v739_v60  ;;  %994 = vst [vmem:[%s1282_s30 + $0x40] sm:$0xff] %v866_v3  ;;  %v868_v9 = vsel %vm611_vm10, %v483_v53, %v740_v63  ;;  %v352_v12 = vmul.f32 %v1243_v0, %v217_v61  ;;  %v353_v13 = vmul.f32 %v1243_v0, %v218_v62 }
  0x23   : > { %995 = vst [vmem:[%s1282_s30 + $0x48] sm:$0xff] %v867_v4  ;;  %v869_v10 = vsel %vm612_vm11, %v484_v54, %v741_v2  ;;  %996 = vst [vmem:[%s1282_s30 + $0x50] sm:$0xff] %v868_v9  ;;  %vm613_vm12 = vcmp.ge.f32.partialorder %v485_v5, 0.0  ;;  %v742_v16 = vmul.f32 %v1264_v11, %v485_v5  ;;  %vm614_vm13 = vcmp.ge.f32.partialorder %v486_v6, 0.0  ;;  %v229_v54 = vld [vmem:[%s1248_s25 + $0xd0] sm:$0xff]  ;;  %v231_v4 = vld [vmem:[%s1248_s25 + $0xe0] sm:$0xff] }
  0x24   : > { %997 = vst [vmem:[%s1282_s30 + $0x58] sm:$0xff] %v869_v10  ;;  %v743_v17 = vmul.f32 %v1264_v11, %v486_v6  ;;  %v487_v18 = vadd.f32 %v1253_v1, %v352_v12  ;;  %v488_v19 = vadd.f32 %v1253_v1, %v353_v13  ;;  %v354_v20 = vmul.f32 %v1243_v0, %v219_v7 }
  0x25   : > { %v355_v21 = vmul.f32 %v1243_v0, %v220_v8  ;;  %v870_v22 = vsel %vm613_vm12, %v485_v5, %v742_v16  ;;  %v356_v24 = vmul.f32 %v1243_v0, %v221_v14  ;;  %v357_v25 = vmul.f32 %v1243_v0, %v222_v15  ;;  %v232_v5 = vld [vmem:[%s1248_s25 + $0xe8] sm:$0xff] }
  0x26   : > { %v871_v23 = vsel %vm614_vm13, %v486_v6, %v743_v17  ;;  %998 = vst [vmem:[%s1282_s30 + $0x60] sm:$0xff] %v870_v22  ;;  %vm615_vm14 = vcmp.ge.f32.partialorder %v487_v18, 0.0  ;;  %v744_v28 = vmul.f32 %v1264_v11, %v487_v18  ;;  %vm616_vm15 = vcmp.ge.f32.partialorder %v488_v19, 0.0 }
  0x27   : > { %999 = vst [vmem:[%s1282_s30 + $0x68] sm:$0xff] %v871_v23  ;;  %v745_v29 = vmul.f32 %v1264_v11, %v488_v19  ;;  %v489_v30 = vadd.f32 %v1253_v1, %v354_v20  ;;  %v490_v31 = vadd.f32 %v1253_v1, %v355_v21  ;;  %v491_v32 = vadd.f32 %v1253_v1, %v356_v24  ;;  %v234_v20 = vld [vmem:[%s1248_s25 + $0xf8] sm:$0xff] }
  0x28   : > { %v492_v33 = vadd.f32 %v1253_v1, %v357_v25  ;;  %v872_v34 = vsel %vm615_vm14, %v487_v18, %v744_v28  ;;  %v358_v36 = vmul.f32 %v1243_v0, %v223_v26  ;;  %v359_v37 = vmul.f32 %v1243_v0, %v224_v27  ;;  %v235_v27 = vld [vmem:[%s1248_s25 + $0x100] sm:$0xff]  ;;  %v236_v28 = vld [vmem:[%s1248_s25 + $0x108] sm:$0xff] }
  0x29   : > { %v873_v35 = vsel %vm616_vm15, %v488_v19, %v745_v29  ;;  %1000 = vst [vmem:[%s1282_s30 + $0x70] sm:$0xff] %v872_v34  ;;  %vm617_vm0 = vcmp.ge.f32.partialorder %v489_v30, 0.0  ;;  %v746_v38 = vmul.f32 %v1264_v11, %v489_v30  ;;  %vm618_vm1 = vcmp.ge.f32.partialorder %v490_v31, 0.0  ;;  %v233_v19 = vld [vmem:[%s1248_s25 + $0xf0] sm:$0xff]  ;;  %v238_v34 = vld [vmem:[%s1248_s25 + $0x118] sm:$0xff] }
  0x2a   : > { %1001 = vst [vmem:[%s1282_s30 + $0x78] sm:$0xff] %v873_v35  ;;  %v747_v39 = vmul.f32 %v1264_v11, %v490_v31  ;;  %vm619_vm2 = vcmp.ge.f32.partialorder %v491_v32, 0.0  ;;  %v748_v42 = vmul.f32 %v1264_v11, %v491_v32  ;;  %vm620_vm3 = vcmp.ge.f32.partialorder %v492_v33, 0.0 }
  0x2b   : > { %v749_v43 = vmul.f32 %v1264_v11, %v492_v33  ;;  %v874_v44 = vsel %vm617_vm0, %v489_v30, %v746_v38  ;;  %v493_v46 = vadd.f32 %v1253_v1, %v358_v36  ;;  %v494_v47 = vadd.f32 %v1253_v1, %v359_v37 }
  0x2c   : > { %v875_v45 = vsel %vm618_vm1, %v490_v31, %v747_v39  ;;  %1002 = vst [vmem:[%s1282_s30 + $0x80] sm:$0xff] %v874_v44  ;;  %v876_v50 = vsel %vm619_vm2, %v491_v32, %v748_v42  ;;  %v360_v52 = vmul.f32 %v1243_v0, %v225_v40  ;;  %v361_v53 = vmul.f32 %v1243_v0, %v226_v41 }
  0x2d   : > { %1003 = vst [vmem:[%s1282_s30 + $0x88] sm:$0xff] %v875_v45  ;;  %v877_v51 = vsel %vm620_vm3, %v492_v33, %v749_v43  ;;  %1004 = vst [vmem:[%s1282_s30 + $0x90] sm:$0xff] %v876_v50  ;;  %vm621_vm4 = vcmp.ge.f32.partialorder %v493_v46, 0.0  ;;  %v750_v56 = vmul.f32 %v1264_v11, %v493_v46  ;;  %vm622_vm5 = vcmp.ge.f32.partialorder %v494_v47, 0.0  ;;  %v237_v33 = vld [vmem:[%s1248_s25 + $0x110] sm:$0xff]  ;;  %v239_v45 = vld [vmem:[%s1248_s25 + $0x120] sm:$0xff] }
  0x2e   : > { %1005 = vst [vmem:[%s1282_s30 + $0x98] sm:$0xff] %v877_v51  ;;  %v751_v57 = vmul.f32 %v1264_v11, %v494_v47  ;;  %v495_v58 = vadd.f32 %v1253_v1, %v360_v52  ;;  %v496_v59 = vadd.f32 %v1253_v1, %v361_v53  ;;  %v362_v60 = vmul.f32 %v1243_v0, %v227_v48 }
  0x2f   : > { %v363_v61 = vmul.f32 %v1243_v0, %v228_v49  ;;  %v878_v62 = vsel %vm621_vm4, %v493_v46, %v750_v56  ;;  %v364_v2 = vmul.f32 %v1243_v0, %v229_v54  ;;  %v365_v3 = vmul.f32 %v1243_v0, %v230_v55  ;;  %v240_v46 = vld [vmem:[%s1248_s25 + $0x128] sm:$0xff] }
  0x30   : > { %v879_v63 = vsel %vm622_vm5, %v494_v47, %v751_v57  ;;  %1006 = vst [vmem:[%s1282_s30 + $0xa0] sm:$0xff] %v878_v62  ;;  %vm623_vm6 = vcmp.ge.f32.partialorder %v495_v58, 0.0  ;;  %v752_v6 = vmul.f32 %v1264_v11, %v495_v58  ;;  %vm624_vm7 = vcmp.ge.f32.partialorder %v496_v59, 0.0 }
  0x31   : > { %1007 = vst [vmem:[%s1282_s30 + $0xa8] sm:$0xff] %v879_v63  ;;  %v753_v7 = vmul.f32 %v1264_v11, %v496_v59  ;;  %v497_v8 = vadd.f32 %v1253_v1, %v362_v60  ;;  %v498_v9 = vadd.f32 %v1253_v1, %v363_v61  ;;  %v499_v10 = vadd.f32 %v1253_v1, %v364_v2  ;;  %v242_v60 = vld [vmem:[%s1248_s25 + $0x138] sm:$0xff] }
  0x32   : > { %v500_v12 = vadd.f32 %v1253_v1, %v365_v3  ;;  %v880_v13 = vsel %vm623_vm6, %v495_v58, %v752_v6  ;;  %v366_v15 = vmul.f32 %v1243_v0, %v231_v4  ;;  %v367_v16 = vmul.f32 %v1243_v0, %v232_v5  ;;  %v243_v5 = vld [vmem:[%s1248_s25 + $0x140] sm:$0xff]  ;;  %v244_v6 = vld [vmem:[%s1248_s25 + $0x148] sm:$0xff] }
  0x33   : > { %v881_v14 = vsel %vm624_vm7, %v496_v59, %v753_v7  ;;  %1008 = vst [vmem:[%s1282_s30 + $0xb0] sm:$0xff] %v880_v13  ;;  %vm625_vm8 = vcmp.ge.f32.partialorder %v497_v8, 0.0  ;;  %v754_v17 = vmul.f32 %v1264_v11, %v497_v8  ;;  %vm626_vm9 = vcmp.ge.f32.partialorder %v498_v9, 0.0  ;;  %v241_v59 = vld [vmem:[%s1248_s25 + $0x130] sm:$0xff]  ;;  %v246_v13 = vld [vmem:[%s1248_s25 + $0x158] sm:$0xff] }
  0x34   : > { %1009 = vst [vmem:[%s1282_s30 + $0xb8] sm:$0xff] %v881_v14  ;;  %v755_v18 = vmul.f32 %v1264_v11, %v498_v9  ;;  %vm627_vm10 = vcmp.ge.f32.partialorder %v499_v10, 0.0  ;;  %v756_v21 = vmul.f32 %v1264_v11, %v499_v10  ;;  %vm628_vm11 = vcmp.ge.f32.partialorder %v500_v12, 0.0 }
  0x35   : > { %v757_v22 = vmul.f32 %v1264_v11, %v500_v12  ;;  %v882_v23 = vsel %vm625_vm8, %v497_v8, %v754_v17  ;;  %v501_v25 = vadd.f32 %v1253_v1, %v366_v15  ;;  %v502_v26 = vadd.f32 %v1253_v1, %v367_v16 }
  0x36   : > { %v883_v24 = vsel %vm626_vm9, %v498_v9, %v755_v18  ;;  %1010 = vst [vmem:[%s1282_s30 + $0xc0] sm:$0xff] %v882_v23  ;;  %v884_v29 = vsel %vm627_vm10, %v499_v10, %v756_v21  ;;  %v368_v31 = vmul.f32 %v1243_v0, %v233_v19  ;;  %v369_v32 = vmul.f32 %v1243_v0, %v234_v20 }
  0x37   : > { %1011 = vst [vmem:[%s1282_s30 + $0xc8] sm:$0xff] %v883_v24  ;;  %v885_v30 = vsel %vm628_vm11, %v500_v12, %v757_v22  ;;  %1012 = vst [vmem:[%s1282_s30 + $0xd0] sm:$0xff] %v884_v29  ;;  %vm629_vm12 = vcmp.ge.f32.partialorder %v501_v25, 0.0  ;;  %v758_v35 = vmul.f32 %v1264_v11, %v501_v25  ;;  %vm630_vm13 = vcmp.ge.f32.partialorder %v502_v26, 0.0  ;;  %v245_v12 = vld [vmem:[%s1248_s25 + $0x150] sm:$0xff]  ;;  %v247_v24 = vld [vmem:[%s1248_s25 + $0x160] sm:$0xff] }
  0x38   : > { %1013 = vst [vmem:[%s1282_s30 + $0xd8] sm:$0xff] %v885_v30  ;;  %v759_v36 = vmul.f32 %v1264_v11, %v502_v26  ;;  %v503_v37 = vadd.f32 %v1253_v1, %v368_v31  ;;  %v504_v38 = vadd.f32 %v1253_v1, %v369_v32  ;;  %v370_v39 = vmul.f32 %v1243_v0, %v235_v27 }
  0x39   : > { %v371_v40 = vmul.f32 %v1243_v0, %v236_v28  ;;  %v886_v41 = vsel %vm629_vm12, %v501_v25, %v758_v35  ;;  %v372_v43 = vmul.f32 %v1243_v0, %v237_v33  ;;  %v373_v44 = vmul.f32 %v1243_v0, %v238_v34  ;;  %v248_v25 = vld [vmem:[%s1248_s25 + $0x168] sm:$0xff] }
  0x3a   : > { %v887_v42 = vsel %vm630_vm13, %v502_v26, %v759_v36  ;;  %1014 = vst [vmem:[%s1282_s30 + $0xe0] sm:$0xff] %v886_v41  ;;  %vm631_vm14 = vcmp.ge.f32.partialorder %v503_v37, 0.0  ;;  %v760_v47 = vmul.f32 %v1264_v11, %v503_v37  ;;  %vm632_vm15 = vcmp.ge.f32.partialorder %v504_v38, 0.0 }
  0x3b   : > { %1015 = vst [vmem:[%s1282_s30 + $0xe8] sm:$0xff] %v887_v42  ;;  %v761_v48 = vmul.f32 %v1264_v11, %v504_v38  ;;  %v505_v49 = vadd.f32 %v1253_v1, %v370_v39  ;;  %v506_v50 = vadd.f32 %v1253_v1, %v371_v40  ;;  %v507_v51 = vadd.f32 %v1253_v1, %v372_v43  ;;  %v250_v39 = vld [vmem:[%s1248_s25 + $0x178] sm:$0xff] }
  0x3c   : > { %v508_v52 = vadd.f32 %v1253_v1, %v373_v44  ;;  %v888_v53 = vsel %vm631_vm14, %v503_v37, %v760_v47  ;;  %v374_v55 = vmul.f32 %v1243_v0, %v239_v45  ;;  %v375_v56 = vmul.f32 %v1243_v0, %v240_v46  ;;  %v251_v46 = vld [vmem:[%s1248_s25 + $0x180] sm:$0xff]  ;;  %v252_v47 = vld [vmem:[%s1248_s25 + $0x188] sm:$0xff] }
  0x3d   : > { %v889_v54 = vsel %vm632_vm15, %v504_v38, %v761_v48  ;;  %1016 = vst [vmem:[%s1282_s30 + $0xf0] sm:$0xff] %v888_v53  ;;  %vm633_vm0 = vcmp.ge.f32.partialorder %v505_v49, 0.0  ;;  %v762_v57 = vmul.f32 %v1264_v11, %v505_v49  ;;  %vm634_vm1 = vcmp.ge.f32.partialorder %v506_v50, 0.0  ;;  %v249_v38 = vld [vmem:[%s1248_s25 + $0x170] sm:$0xff]  ;;  %v254_v53 = vld [vmem:[%s1248_s25 + $0x198] sm:$0xff] }
  0x3e   : > { %1017 = vst [vmem:[%s1282_s30 + $0xf8] sm:$0xff] %v889_v54  ;;  %v763_v58 = vmul.f32 %v1264_v11, %v506_v50  ;;  %vm635_vm2 = vcmp.ge.f32.partialorder %v507_v51, 0.0  ;;  %v764_v61 = vmul.f32 %v1264_v11, %v507_v51  ;;  %vm636_vm3 = vcmp.ge.f32.partialorder %v508_v52, 0.0 }
  0x3f   : > { %v765_v62 = vmul.f32 %v1264_v11, %v508_v52  ;;  %v890_v63 = vsel %vm633_vm0, %v505_v49, %v762_v57  ;;  %v509_v3 = vadd.f32 %v1253_v1, %v374_v55  ;;  %v510_v4 = vadd.f32 %v1253_v1, %v375_v56 }
  0x40   : > { %v891_v2 = vsel %vm634_vm1, %v506_v50, %v763_v58  ;;  %1018 = vst [vmem:[%s1282_s30 + $0x100] sm:$0xff] %v890_v63  ;;  %v892_v7 = vsel %vm635_vm2, %v507_v51, %v764_v61  ;;  %v376_v9 = vmul.f32 %v1243_v0, %v241_v59  ;;  %v377_v10 = vmul.f32 %v1243_v0, %v242_v60 }
  0x41   : > { %1019 = vst [vmem:[%s1282_s30 + $0x108] sm:$0xff] %v891_v2  ;;  %v893_v8 = vsel %vm636_vm3, %v508_v52, %v765_v62  ;;  %1020 = vst [vmem:[%s1282_s30 + $0x110] sm:$0xff] %v892_v7  ;;  %vm637_vm4 = vcmp.ge.f32.partialorder %v509_v3, 0.0  ;;  %v766_v14 = vmul.f32 %v1264_v11, %v509_v3  ;;  %vm638_vm5 = vcmp.ge.f32.partialorder %v510_v4, 0.0  ;;  %v253_v52 = vld [vmem:[%s1248_s25 + $0x190] sm:$0xff]  ;;  %v255_v2 = vld [vmem:[%s1248_s25 + $0x1a0] sm:$0xff] }
  0x42   : > { %1021 = vst [vmem:[%s1282_s30 + $0x118] sm:$0xff] %v893_v8  ;;  %v767_v15 = vmul.f32 %v1264_v11, %v510_v4  ;;  %v511_v16 = vadd.f32 %v1253_v1, %v376_v9  ;;  %v512_v17 = vadd.f32 %v1253_v1, %v377_v10  ;;  %v378_v18 = vmul.f32 %v1243_v0, %v243_v5 }
  0x43   : > { %v379_v19 = vmul.f32 %v1243_v0, %v244_v6  ;;  %v894_v20 = vsel %vm637_vm4, %v509_v3, %v766_v14  ;;  %v380_v22 = vmul.f32 %v1243_v0, %v245_v12  ;;  %v381_v23 = vmul.f32 %v1243_v0, %v246_v13  ;;  %v256_v3 = vld [vmem:[%s1248_s25 + $0x1a8] sm:$0xff] }
  0x44   : > { %v895_v21 = vsel %vm638_vm5, %v510_v4, %v767_v15  ;;  %1022 = vst [vmem:[%s1282_s30 + $0x120] sm:$0xff] %v894_v20  ;;  %vm639_vm6 = vcmp.ge.f32.partialorder %v511_v16, 0.0  ;;  %v768_v26 = vmul.f32 %v1264_v11, %v511_v16  ;;  %vm640_vm7 = vcmp.ge.f32.partialorder %v512_v17, 0.0 }
  0x45   : > { %1023 = vst [vmem:[%s1282_s30 + $0x128] sm:$0xff] %v895_v21  ;;  %v769_v27 = vmul.f32 %v1264_v11, %v512_v17  ;;  %v513_v28 = vadd.f32 %v1253_v1, %v378_v18  ;;  %v514_v29 = vadd.f32 %v1253_v1, %v379_v19  ;;  %v515_v30 = vadd.f32 %v1253_v1, %v380_v22  ;;  %v258_v18 = vld [vmem:[%s1248_s25 + $0x1b8] sm:$0xff] }
  0x46   : > { %v516_v31 = vadd.f32 %v1253_v1, %v381_v23  ;;  %v896_v32 = vsel %vm639_vm6, %v511_v16, %v768_v26  ;;  %v382_v34 = vmul.f32 %v1243_v0, %v247_v24  ;;  %v383_v35 = vmul.f32 %v1243_v0, %v248_v25  ;;  %v259_v25 = vld [vmem:[%s1248_s25 + $0x1c0] sm:$0xff]  ;;  %v260_v26 = vld [vmem:[%s1248_s25 + $0x1c8] sm:$0xff] }
  0x47   : > { %v897_v33 = vsel %vm640_vm7, %v512_v17, %v769_v27  ;;  %1024 = vst [vmem:[%s1282_s30 + $0x130] sm:$0xff] %v896_v32  ;;  %vm641_vm8 = vcmp.ge.f32.partialorder %v513_v28, 0.0  ;;  %v770_v36 = vmul.f32 %v1264_v11, %v513_v28  ;;  %vm642_vm9 = vcmp.ge.f32.partialorder %v514_v29, 0.0  ;;  %v257_v17 = vld [vmem:[%s1248_s25 + $0x1b0] sm:$0xff]  ;;  %v262_v32 = vld [vmem:[%s1248_s25 + $0x1d8] sm:$0xff] }
  0x48   : > { %1025 = vst [vmem:[%s1282_s30 + $0x138] sm:$0xff] %v897_v33  ;;  %v771_v37 = vmul.f32 %v1264_v11, %v514_v29  ;;  %vm643_vm10 = vcmp.ge.f32.partialorder %v515_v30, 0.0  ;;  %v772_v40 = vmul.f32 %v1264_v11, %v515_v30  ;;  %vm644_vm11 = vcmp.ge.f32.partialorder %v516_v31, 0.0 }
  0x49   : > { %v773_v41 = vmul.f32 %v1264_v11, %v516_v31  ;;  %v898_v42 = vsel %vm641_vm8, %v513_v28, %v770_v36  ;;  %v517_v44 = vadd.f32 %v1253_v1, %v382_v34  ;;  %v518_v45 = vadd.f32 %v1253_v1, %v383_v35 }
  0x4a   : > { %v899_v43 = vsel %vm642_vm9, %v514_v29, %v771_v37  ;;  %1026 = vst [vmem:[%s1282_s30 + $0x140] sm:$0xff] %v898_v42  ;;  %v900_v48 = vsel %vm643_vm10, %v515_v30, %v772_v40  ;;  %v384_v50 = vmul.f32 %v1243_v0, %v249_v38  ;;  %v385_v51 = vmul.f32 %v1243_v0, %v250_v39 }
  0x4b   : > { %1027 = vst [vmem:[%s1282_s30 + $0x148] sm:$0xff] %v899_v43  ;;  %v901_v49 = vsel %vm644_vm11, %v516_v31, %v773_v41  ;;  %1028 = vst [vmem:[%s1282_s30 + $0x150] sm:$0xff] %v900_v48  ;;  %vm645_vm12 = vcmp.ge.f32.partialorder %v517_v44, 0.0  ;;  %v774_v54 = vmul.f32 %v1264_v11, %v517_v44  ;;  %vm646_vm13 = vcmp.ge.f32.partialorder %v518_v45, 0.0  ;;  %v261_v31 = vld [vmem:[%s1248_s25 + $0x1d0] sm:$0xff]  ;;  %v263_v43 = vld [vmem:[%s1248_s25 + $0x1e0] sm:$0xff] }
  0x4c   : > { %1029 = vst [vmem:[%s1282_s30 + $0x158] sm:$0xff] %v901_v49  ;;  %v775_v55 = vmul.f32 %v1264_v11, %v518_v45  ;;  %v519_v56 = vadd.f32 %v1253_v1, %v384_v50  ;;  %v520_v57 = vadd.f32 %v1253_v1, %v385_v51  ;;  %v386_v58 = vmul.f32 %v1243_v0, %v251_v46 }
  0x4d   : > { %v387_v59 = vmul.f32 %v1243_v0, %v252_v47  ;;  %v902_v60 = vsel %vm645_vm12, %v517_v44, %v774_v54  ;;  %v388_v62 = vmul.f32 %v1243_v0, %v253_v52  ;;  %v389_v63 = vmul.f32 %v1243_v0, %v254_v53  ;;  %v264_v44 = vld [vmem:[%s1248_s25 + $0x1e8] sm:$0xff] }
  0x4e   : > { %v903_v61 = vsel %vm646_vm13, %v518_v45, %v775_v55  ;;  %1030 = vst [vmem:[%s1282_s30 + $0x160] sm:$0xff] %v902_v60  ;;  %vm647_vm14 = vcmp.ge.f32.partialorder %v519_v56, 0.0  ;;  %v776_v4 = vmul.f32 %v1264_v11, %v519_v56  ;;  %vm648_vm15 = vcmp.ge.f32.partialorder %v520_v57, 0.0 }
  0x4f   : > { %1031 = vst [vmem:[%s1282_s30 + $0x168] sm:$0xff] %v903_v61  ;;  %v777_v5 = vmul.f32 %v1264_v11, %v520_v57  ;;  %v521_v6 = vadd.f32 %v1253_v1, %v386_v58  ;;  %v522_v7 = vadd.f32 %v1253_v1, %v387_v59  ;;  %v523_v8 = vadd.f32 %v1253_v1, %v388_v62  ;;  %v266_v58 = vld [vmem:[%s1248_s25 + $0x1f8] sm:$0xff] }
  0x50   : > { %v524_v9 = vadd.f32 %v1253_v1, %v389_v63  ;;  %v904_v10 = vsel %vm647_vm14, %v519_v56, %v776_v4  ;;  %v390_v13 = vmul.f32 %v1243_v0, %v255_v2  ;;  %v391_v14 = vmul.f32 %v1243_v0, %v256_v3  ;;  %v267_v3 = vld [vmem:[%s1248_s25 + $0x200] sm:$0xff]  ;;  %v268_v4 = vld [vmem:[%s1248_s25 + $0x208] sm:$0xff] }
  0x51   : > { %v905_v12 = vsel %vm648_vm15, %v520_v57, %v777_v5  ;;  %1032 = vst [vmem:[%s1282_s30 + $0x170] sm:$0xff] %v904_v10  ;;  %vm649_vm0 = vcmp.ge.f32.partialorder %v521_v6, 0.0  ;;  %v778_v15 = vmul.f32 %v1264_v11, %v521_v6  ;;  %vm650_vm1 = vcmp.ge.f32.partialorder %v522_v7, 0.0  ;;  %v265_v57 = vld [vmem:[%s1248_s25 + $0x1f0] sm:$0xff]  ;;  %v270_v10 = vld [vmem:[%s1248_s25 + $0x218] sm:$0xff] }
  0x52   : > { %1033 = vst [vmem:[%s1282_s30 + $0x178] sm:$0xff] %v905_v12  ;;  %v779_v16 = vmul.f32 %v1264_v11, %v522_v7  ;;  %vm651_vm2 = vcmp.ge.f32.partialorder %v523_v8, 0.0  ;;  %v780_v19 = vmul.f32 %v1264_v11, %v523_v8  ;;  %vm652_vm3 = vcmp.ge.f32.partialorder %v524_v9, 0.0 }
  0x53   : > { %v781_v20 = vmul.f32 %v1264_v11, %v524_v9  ;;  %v906_v21 = vsel %vm649_vm0, %v521_v6, %v778_v15  ;;  %v525_v23 = vadd.f32 %v1253_v1, %v390_v13  ;;  %v526_v24 = vadd.f32 %v1253_v1, %v391_v14 }
  0x54   : > { %v907_v22 = vsel %vm650_vm1, %v522_v7, %v779_v16  ;;  %1034 = vst [vmem:[%s1282_s30 + $0x180] sm:$0xff] %v906_v21  ;;  %v908_v27 = vsel %vm651_vm2, %v523_v8, %v780_v19  ;;  %v392_v29 = vmul.f32 %v1243_v0, %v257_v17  ;;  %v393_v30 = vmul.f32 %v1243_v0, %v258_v18 }
  0x55   : > { %1035 = vst [vmem:[%s1282_s30 + $0x188] sm:$0xff] %v907_v22  ;;  %v909_v28 = vsel %vm652_vm3, %v524_v9, %v781_v20  ;;  %1036 = vst [vmem:[%s1282_s30 + $0x190] sm:$0xff] %v908_v27  ;;  %vm653_vm4 = vcmp.ge.f32.partialorder %v525_v23, 0.0  ;;  %v782_v33 = vmul.f32 %v1264_v11, %v525_v23  ;;  %vm654_vm5 = vcmp.ge.f32.partialorder %v526_v24, 0.0  ;;  %v269_v9 = vld [vmem:[%s1248_s25 + $0x210] sm:$0xff]  ;;  %v271_v22 = vld [vmem:[%s1248_s25 + $0x220] sm:$0xff] }
  0x56   : > { %1037 = vst [vmem:[%s1282_s30 + $0x198] sm:$0xff] %v909_v28  ;;  %v783_v34 = vmul.f32 %v1264_v11, %v526_v24  ;;  %v527_v35 = vadd.f32 %v1253_v1, %v392_v29  ;;  %v528_v36 = vadd.f32 %v1253_v1, %v393_v30  ;;  %v394_v37 = vmul.f32 %v1243_v0, %v259_v25 }
  0x57   : > { %v395_v38 = vmul.f32 %v1243_v0, %v260_v26  ;;  %v910_v39 = vsel %vm653_vm4, %v525_v23, %v782_v33  ;;  %v396_v41 = vmul.f32 %v1243_v0, %v261_v31  ;;  %v397_v42 = vmul.f32 %v1243_v0, %v262_v32  ;;  %v272_v23 = vld [vmem:[%s1248_s25 + $0x228] sm:$0xff] }
  0x58   : > { %v911_v40 = vsel %vm654_vm5, %v526_v24, %v783_v34  ;;  %1038 = vst [vmem:[%s1282_s30 + $0x1a0] sm:$0xff] %v910_v39  ;;  %vm655_vm6 = vcmp.ge.f32.partialorder %v527_v35, 0.0  ;;  %v784_v45 = vmul.f32 %v1264_v11, %v527_v35  ;;  %vm656_vm7 = vcmp.ge.f32.partialorder %v528_v36, 0.0 }
  0x59   : > { %1039 = vst [vmem:[%s1282_s30 + $0x1a8] sm:$0xff] %v911_v40  ;;  %v785_v46 = vmul.f32 %v1264_v11, %v528_v36  ;;  %v529_v47 = vadd.f32 %v1253_v1, %v394_v37  ;;  %v530_v48 = vadd.f32 %v1253_v1, %v395_v38  ;;  %v531_v49 = vadd.f32 %v1253_v1, %v396_v41  ;;  %v274_v37 = vld [vmem:[%s1248_s25 + $0x238] sm:$0xff] }
  0x5a   : > { %v532_v50 = vadd.f32 %v1253_v1, %v397_v42  ;;  %v912_v51 = vsel %vm655_vm6, %v527_v35, %v784_v45  ;;  %v398_v53 = vmul.f32 %v1243_v0, %v263_v43  ;;  %v399_v54 = vmul.f32 %v1243_v0, %v264_v44  ;;  %v275_v44 = vld [vmem:[%s1248_s25 + $0x240] sm:$0xff]  ;;  %v276_v45 = vld [vmem:[%s1248_s25 + $0x248] sm:$0xff] }
  0x5b   : > { %v913_v52 = vsel %vm656_vm7, %v528_v36, %v785_v46  ;;  %1040 = vst [vmem:[%s1282_s30 + $0x1b0] sm:$0xff] %v912_v51  ;;  %vm657_vm8 = vcmp.ge.f32.partialorder %v529_v47, 0.0  ;;  %v786_v55 = vmul.f32 %v1264_v11, %v529_v47  ;;  %vm658_vm9 = vcmp.ge.f32.partialorder %v530_v48, 0.0  ;;  %v273_v36 = vld [vmem:[%s1248_s25 + $0x230] sm:$0xff]  ;;  %v278_v51 = vld [vmem:[%s1248_s25 + $0x258] sm:$0xff] }
  0x5c   : > { %1041 = vst [vmem:[%s1282_s30 + $0x1b8] sm:$0xff] %v913_v52  ;;  %v787_v56 = vmul.f32 %v1264_v11, %v530_v48  ;;  %vm659_vm10 = vcmp.ge.f32.partialorder %v531_v49, 0.0  ;;  %v788_v59 = vmul.f32 %v1264_v11, %v531_v49  ;;  %vm660_vm11 = vcmp.ge.f32.partialorder %v532_v50, 0.0 }
  0x5d   : > { %v789_v60 = vmul.f32 %v1264_v11, %v532_v50  ;;  %v914_v61 = vsel %vm657_vm8, %v529_v47, %v786_v55  ;;  %v533_v63 = vadd.f32 %v1253_v1, %v398_v53  ;;  %v534_v2 = vadd.f32 %v1253_v1, %v399_v54 }
  0x5e   : > { %v915_v62 = vsel %vm658_vm9, %v530_v48, %v787_v56  ;;  %1042 = vst [vmem:[%s1282_s30 + $0x1c0] sm:$0xff] %v914_v61  ;;  %v916_v5 = vsel %vm659_vm10, %v531_v49, %v788_v59  ;;  %v400_v7 = vmul.f32 %v1243_v0, %v265_v57  ;;  %v401_v8 = vmul.f32 %v1243_v0, %v266_v58 }
  0x5f   : > { %1043 = vst [vmem:[%s1282_s30 + $0x1c8] sm:$0xff] %v915_v62  ;;  %v917_v6 = vsel %vm660_vm11, %v532_v50, %v789_v60  ;;  %1044 = vst [vmem:[%s1282_s30 + $0x1d0] sm:$0xff] %v916_v5  ;;  %vm661_vm12 = vcmp.ge.f32.partialorder %v533_v63, 0.0  ;;  %v790_v12 = vmul.f32 %v1264_v11, %v533_v63  ;;  %vm662_vm13 = vcmp.ge.f32.partialorder %v534_v2, 0.0  ;;  %v277_v50 = vld [vmem:[%s1248_s25 + $0x250] sm:$0xff]  ;;  %v279_v62 = vld [vmem:[%s1248_s25 + $0x260] sm:$0xff] }
  0x60   : > { %1045 = vst [vmem:[%s1282_s30 + $0x1d8] sm:$0xff] %v917_v6  ;;  %v791_v13 = vmul.f32 %v1264_v11, %v534_v2  ;;  %v535_v14 = vadd.f32 %v1253_v1, %v400_v7  ;;  %v536_v15 = vadd.f32 %v1253_v1, %v401_v8  ;;  %v402_v16 = vmul.f32 %v1243_v0, %v267_v3  ;;  %v1633_v3 = vld [vmem:[%s1917_s2] ss:$0 sm:$0xff] }
  0x61   : > { %v403_v17 = vmul.f32 %v1243_v0, %v268_v4  ;;  %v918_v18 = vsel %vm661_vm12, %v533_v63, %v790_v12  ;;  %v404_v20 = vmul.f32 %v1243_v0, %v269_v9  ;;  %v405_v21 = vmul.f32 %v1243_v0, %v270_v10  ;;  %v280_v63 = vld [vmem:[%s1248_s25 + $0x268] sm:$0xff]  ;;  %v1642_v9 = vld [vmem:[%s1916_s1] ss:$0 sm:$0xff] }
  0x62   : > { %v919_v19 = vsel %vm662_vm13, %v534_v2, %v791_v13  ;;  %1046 = vst [vmem:[%s1282_s30 + $0x1e0] sm:$0xff] %v918_v18  ;;  %vm663_vm14 = vcmp.ge.f32.partialorder %v535_v14, 0.0  ;;  %v792_v24 = vmul.f32 %v1264_v11, %v535_v14  ;;  %vm664_vm15 = vcmp.ge.f32.partialorder %v536_v15, 0.0 }
  0x63   : > { %1047 = vst [vmem:[%s1282_s30 + $0x1e8] sm:$0xff] %v919_v19  ;;  %v793_v25 = vmul.f32 %v1264_v11, %v536_v15  ;;  %v537_v26 = vadd.f32 %v1253_v1, %v402_v16  ;;  %v538_v27 = vadd.f32 %v1253_v1, %v403_v17  ;;  %v539_v28 = vadd.f32 %v1253_v1, %v404_v20  ;;  %v282_v16 = vld [vmem:[%s1248_s25 + $0x278] sm:$0xff] }
  0x64   : > { %v540_v29 = vadd.f32 %v1253_v1, %v405_v21  ;;  %v920_v30 = vsel %vm663_vm14, %v535_v14, %v792_v24  ;;  %v406_v32 = vmul.f32 %v1243_v0, %v271_v22  ;;  %v407_v33 = vmul.f32 %v1243_v0, %v272_v23  ;;  %v283_v23 = vld [vmem:[%s1248_s25 + $0x280] sm:$0xff]  ;;  %v284_v24 = vld [vmem:[%s1248_s25 + $0x288] sm:$0xff] }
  0x65   : > { %v921_v31 = vsel %vm664_vm15, %v536_v15, %v793_v25  ;;  %1048 = vst [vmem:[%s1282_s30 + $0x1f0] sm:$0xff] %v920_v30  ;;  %vm665_vm0 = vcmp.ge.f32.partialorder %v537_v26, 0.0  ;;  %v794_v34 = vmul.f32 %v1264_v11, %v537_v26  ;;  %vm666_vm1 = vcmp.ge.f32.partialorder %v538_v27, 0.0  ;;  %v281_v15 = vld [vmem:[%s1248_s25 + $0x270] sm:$0xff]  ;;  %v286_v30 = vld [vmem:[%s1248_s25 + $0x298] sm:$0xff] }
  0x66   : > { %1049 = vst [vmem:[%s1282_s30 + $0x1f8] sm:$0xff] %v921_v31  ;;  %v795_v35 = vmul.f32 %v1264_v11, %v538_v27  ;;  %vm667_vm2 = vcmp.ge.f32.partialorder %v539_v28, 0.0  ;;  %v796_v38 = vmul.f32 %v1264_v11, %v539_v28  ;;  %vm668_vm3 = vcmp.ge.f32.partialorder %v540_v29, 0.0 }
  0x67   : > { %v797_v39 = vmul.f32 %v1264_v11, %v540_v29  ;;  %v922_v40 = vsel %vm665_vm0, %v537_v26, %v794_v34  ;;  %v541_v42 = vadd.f32 %v1253_v1, %v406_v32  ;;  %v542_v43 = vadd.f32 %v1253_v1, %v407_v33 }
  0x68   : > { %v923_v41 = vsel %vm666_vm1, %v538_v27, %v795_v35  ;;  %1050 = vst [vmem:[%s1282_s30 + $0x200] sm:$0xff] %v922_v40  ;;  %v924_v46 = vsel %vm667_vm2, %v539_v28, %v796_v38  ;;  %v408_v48 = vmul.f32 %v1243_v0, %v273_v36  ;;  %v409_v49 = vmul.f32 %v1243_v0, %v274_v37 }
  0x69   : > { %1051 = vst [vmem:[%s1282_s30 + $0x208] sm:$0xff] %v923_v41  ;;  %v925_v47 = vsel %vm668_vm3, %v540_v29, %v797_v39  ;;  %1052 = vst [vmem:[%s1282_s30 + $0x210] sm:$0xff] %v924_v46  ;;  %vm669_vm4 = vcmp.ge.f32.partialorder %v541_v42, 0.0  ;;  %v798_v52 = vmul.f32 %v1264_v11, %v541_v42  ;;  %vm670_vm5 = vcmp.ge.f32.partialorder %v542_v43, 0.0  ;;  %v285_v29 = vld [vmem:[%s1248_s25 + $0x290] sm:$0xff]  ;;  %v287_v41 = vld [vmem:[%s1248_s25 + $0x2a0] sm:$0xff] }
  0x6a   : > { %1053 = vst [vmem:[%s1282_s30 + $0x218] sm:$0xff] %v925_v47  ;;  %v799_v53 = vmul.f32 %v1264_v11, %v542_v43  ;;  %v543_v54 = vadd.f32 %v1253_v1, %v408_v48  ;;  %v544_v55 = vadd.f32 %v1253_v1, %v409_v49  ;;  %v410_v56 = vmul.f32 %v1243_v0, %v275_v44 }
  0x6b   : > { %v411_v57 = vmul.f32 %v1243_v0, %v276_v45  ;;  %v926_v58 = vsel %vm669_vm4, %v541_v42, %v798_v52  ;;  %v412_v60 = vmul.f32 %v1243_v0, %v277_v50  ;;  %v413_v61 = vmul.f32 %v1243_v0, %v278_v51  ;;  %v288_v42 = vld [vmem:[%s1248_s25 + $0x2a8] sm:$0xff] }
  0x6c   : > { %v927_v59 = vsel %vm670_vm5, %v542_v43, %v799_v53  ;;  %1054 = vst [vmem:[%s1282_s30 + $0x220] sm:$0xff] %v926_v58  ;;  %vm671_vm6 = vcmp.ge.f32.partialorder %v543_v54, 0.0  ;;  %v800_v2 = vmul.f32 %v1264_v11, %v543_v54  ;;  %vm672_vm7 = vcmp.ge.f32.partialorder %v544_v55, 0.0 }
  0x6d   : > { %1055 = vst [vmem:[%s1282_s30 + $0x228] sm:$0xff] %v927_v59  ;;  %v801_v1 = vmul.f32 %v1264_v11, %v544_v55  ;;  %v545_v0 = vadd.f32 %v1633_v3, %v410_v56  ;;  %v546_v4 = vadd.f32 %v1633_v3, %v411_v57  ;;  %v547_v5 = vadd.f32 %v1633_v3, %v412_v60  ;;  %v290_v56 = vld [vmem:[%s1248_s25 + $0x2b8] sm:$0xff] }
  0x6e   : > { %v548_v6 = vadd.f32 %v1633_v3, %v413_v61  ;;  %v928_v7 = vsel %vm671_vm6, %v543_v54, %v800_v2  ;;  %v414_v10 = vmul.f32 %v1642_v9, %v279_v62  ;;  %v415_v12 = vmul.f32 %v1642_v9, %v280_v63  ;;  %v291_v63 = vld [vmem:[%s1248_s25 + $0x2c0] sm:$0xff]  ;;  %v292_v2 = vld [vmem:[%s1248_s25 + $0x2c8] sm:$0xff] }
  0x6f   : > { %v929_v8 = vsel %vm672_vm7, %v544_v55, %v801_v1  ;;  %1056 = vst [vmem:[%s1282_s30 + $0x230] sm:$0xff] %v928_v7  ;;  %vm673_vm8 = vcmp.ge.f32.partialorder %v545_v0, 0.0  ;;  %v802_v13 = vmul.f32 %v1264_v11, %v545_v0  ;;  %vm674_vm9 = vcmp.ge.f32.partialorder %v546_v4, 0.0  ;;  %v289_v55 = vld [vmem:[%s1248_s25 + $0x2b0] sm:$0xff]  ;;  %v294_v7 = vld [vmem:[%s1248_s25 + $0x2d8] sm:$0xff] }
  0x70   : > { %1057 = vst [vmem:[%s1282_s30 + $0x238] sm:$0xff] %v929_v8  ;;  %v803_v14 = vmul.f32 %v1264_v11, %v546_v4  ;;  %vm675_vm10 = vcmp.ge.f32.partialorder %v547_v5, 0.0  ;;  %v804_v17 = vmul.f32 %v1264_v11, %v547_v5  ;;  %vm676_vm11 = vcmp.ge.f32.partialorder %v548_v6, 0.0 }
  0x71   : > { %v805_v18 = vmul.f32 %v1264_v11, %v548_v6  ;;  %v930_v19 = vsel %vm673_vm8, %v545_v0, %v802_v13  ;;  %v549_v21 = vadd.f32 %v1633_v3, %v414_v10  ;;  %v550_v22 = vadd.f32 %v1633_v3, %v415_v12 }
  0x72   : > { %v931_v20 = vsel %vm674_vm9, %v546_v4, %v803_v14  ;;  %1058 = vst [vmem:[%s1282_s30 + $0x240] sm:$0xff] %v930_v19  ;;  %v932_v25 = vsel %vm675_vm10, %v547_v5, %v804_v17  ;;  %v416_v27 = vmul.f32 %v1642_v9, %v281_v15  ;;  %v417_v28 = vmul.f32 %v1642_v9, %v282_v16 }
  0x73   : > { %1059 = vst [vmem:[%s1282_s30 + $0x248] sm:$0xff] %v931_v20  ;;  %v933_v26 = vsel %vm676_vm11, %v548_v6, %v805_v18  ;;  %1060 = vst [vmem:[%s1282_s30 + $0x250] sm:$0xff] %v932_v25  ;;  %vm677_vm12 = vcmp.ge.f32.partialorder %v549_v21, 0.0  ;;  %v806_v31 = vmul.f32 %v1264_v11, %v549_v21  ;;  %vm678_vm13 = vcmp.ge.f32.partialorder %v550_v22, 0.0  ;;  %v293_v6 = vld [vmem:[%s1248_s25 + $0x2d0] sm:$0xff]  ;;  %v295_v20 = vld [vmem:[%s1248_s25 + $0x2e0] sm:$0xff] }
  0x74   : > { %1061 = vst [vmem:[%s1282_s30 + $0x258] sm:$0xff] %v933_v26  ;;  %v807_v32 = vmul.f32 %v1264_v11, %v550_v22  ;;  %v551_v33 = vadd.f32 %v1633_v3, %v416_v27  ;;  %v552_v34 = vadd.f32 %v1633_v3, %v417_v28  ;;  %v418_v35 = vmul.f32 %v1642_v9, %v283_v23 }
  0x75   : > { %v419_v36 = vmul.f32 %v1642_v9, %v284_v24  ;;  %v934_v37 = vsel %vm677_vm12, %v549_v21, %v806_v31  ;;  %v420_v39 = vmul.f32 %v1642_v9, %v285_v29  ;;  %v421_v40 = vmul.f32 %v1642_v9, %v286_v30  ;;  %v296_v21 = vld [vmem:[%s1248_s25 + $0x2e8] sm:$0xff] }
  0x76   : > { %v935_v38 = vsel %vm678_vm13, %v550_v22, %v807_v32  ;;  %1062 = vst [vmem:[%s1282_s30 + $0x260] sm:$0xff] %v934_v37  ;;  %vm679_vm14 = vcmp.ge.f32.partialorder %v551_v33, 0.0  ;;  %v808_v43 = vmul.f32 %v1264_v11, %v551_v33  ;;  %vm680_vm15 = vcmp.ge.f32.partialorder %v552_v34, 0.0 }
  0x77   : > { %1063 = vst [vmem:[%s1282_s30 + $0x268] sm:$0xff] %v935_v38  ;;  %v809_v44 = vmul.f32 %v1264_v11, %v552_v34  ;;  %v553_v45 = vadd.f32 %v1633_v3, %v418_v35  ;;  %v554_v46 = vadd.f32 %v1633_v3, %v419_v36  ;;  %v555_v47 = vadd.f32 %v1633_v3, %v420_v39  ;;  %v298_v35 = vld [vmem:[%s1248_s25 + $0x2f8] sm:$0xff] }
  0x78   : > { %v556_v48 = vadd.f32 %v1633_v3, %v421_v40  ;;  %v936_v49 = vsel %vm679_vm14, %v551_v33, %v808_v43  ;;  %v422_v51 = vmul.f32 %v1642_v9, %v287_v41  ;;  %v423_v52 = vmul.f32 %v1642_v9, %v288_v42  ;;  %v299_v42 = vld [vmem:[%s1248_s25 + $0x300] sm:$0xff]  ;;  %v300_v43 = vld [vmem:[%s1248_s25 + $0x308] sm:$0xff] }
  0x79   : > { %v937_v50 = vsel %vm680_vm15, %v552_v34, %v809_v44  ;;  %1064 = vst [vmem:[%s1282_s30 + $0x270] sm:$0xff] %v936_v49  ;;  %vm681_vm0 = vcmp.ge.f32.partialorder %v553_v45, 0.0  ;;  %v810_v53 = vmul.f32 %v1264_v11, %v553_v45  ;;  %vm682_vm1 = vcmp.ge.f32.partialorder %v554_v46, 0.0  ;;  %v297_v34 = vld [vmem:[%s1248_s25 + $0x2f0] sm:$0xff]  ;;  %v302_v49 = vld [vmem:[%s1248_s25 + $0x318] sm:$0xff] }
  0x7a   : > { %1065 = vst [vmem:[%s1282_s30 + $0x278] sm:$0xff] %v937_v50  ;;  %v811_v54 = vmul.f32 %v1264_v11, %v554_v46  ;;  %vm683_vm2 = vcmp.ge.f32.partialorder %v555_v47, 0.0  ;;  %v812_v57 = vmul.f32 %v1264_v11, %v555_v47  ;;  %vm684_vm3 = vcmp.ge.f32.partialorder %v556_v48, 0.0 }
  0x7b   : > { %v813_v58 = vmul.f32 %v1264_v11, %v556_v48  ;;  %v938_v59 = vsel %vm681_vm0, %v553_v45, %v810_v53  ;;  %v557_v61 = vadd.f32 %v1633_v3, %v422_v51  ;;  %v558_v62 = vadd.f32 %v1633_v3, %v423_v52 }
  0x7c   : > { %v939_v60 = vsel %vm682_vm1, %v554_v46, %v811_v54  ;;  %1066 = vst [vmem:[%s1282_s30 + $0x280] sm:$0xff] %v938_v59  ;;  %v940_v1 = vsel %vm683_vm2, %v555_v47, %v812_v57  ;;  %v424_v4 = vmul.f32 %v1642_v9, %v289_v55  ;;  %v425_v5 = vmul.f32 %v1642_v9, %v290_v56 }
  0x7d   : > { %1067 = vst [vmem:[%s1282_s30 + $0x288] sm:$0xff] %v939_v60  ;;  %v941_v0 = vsel %vm684_vm3, %v556_v48, %v813_v58  ;;  %1068 = vst [vmem:[%s1282_s30 + $0x290] sm:$0xff] %v940_v1  ;;  %vm685_vm4 = vcmp.ge.f32.partialorder %v557_v61, 0.0  ;;  %v814_v8 = vmul.f32 %v1264_v11, %v557_v61  ;;  %vm686_vm5 = vcmp.ge.f32.partialorder %v558_v62, 0.0  ;;  %v301_v48 = vld [vmem:[%s1248_s25 + $0x310] sm:$0xff]  ;;  %v303_v60 = vld [vmem:[%s1248_s25 + $0x320] sm:$0xff] }
  0x7e   : > { %1069 = vst [vmem:[%s1282_s30 + $0x298] sm:$0xff] %v941_v0  ;;  %v815_v10 = vmul.f32 %v1264_v11, %v558_v62  ;;  %v559_v12 = vadd.f32 %v1633_v3, %v424_v4  ;;  %v560_v13 = vadd.f32 %v1633_v3, %v425_v5  ;;  %v426_v14 = vmul.f32 %v1642_v9, %v291_v63 }
  0x7f   : > { %v427_v15 = vmul.f32 %v1642_v9, %v292_v2  ;;  %v942_v16 = vsel %vm685_vm4, %v557_v61, %v814_v8  ;;  %v428_v18 = vmul.f32 %v1642_v9, %v293_v6  ;;  %v429_v19 = vmul.f32 %v1642_v9, %v294_v7  ;;  %v304_v61 = vld [vmem:[%s1248_s25 + $0x328] sm:$0xff] }
  0x80   : > { %v943_v17 = vsel %vm686_vm5, %v558_v62, %v815_v10  ;;  %1070 = vst [vmem:[%s1282_s30 + $0x2a0] sm:$0xff] %v942_v16  ;;  %vm687_vm6 = vcmp.ge.f32.partialorder %v559_v12, 0.0  ;;  %v816_v22 = vmul.f32 %v1264_v11, %v559_v12  ;;  %vm688_vm7 = vcmp.ge.f32.partialorder %v560_v13, 0.0 }
  0x81   : > { %1071 = vst [vmem:[%s1282_s30 + $0x2a8] sm:$0xff] %v943_v17  ;;  %v817_v23 = vmul.f32 %v1264_v11, %v560_v13  ;;  %v561_v24 = vadd.f32 %v1633_v3, %v426_v14  ;;  %v562_v25 = vadd.f32 %v1633_v3, %v427_v15  ;;  %v563_v26 = vadd.f32 %v1633_v3, %v428_v18  ;;  %v306_v14 = vld [vmem:[%s1248_s25 + $0x338] sm:$0xff] }
  0x82   : > { %v564_v27 = vadd.f32 %v1633_v3, %v429_v19  ;;  %v944_v28 = vsel %vm687_vm6, %v559_v12, %v816_v22  ;;  %v430_v30 = vmul.f32 %v1642_v9, %v295_v20  ;;  %v431_v31 = vmul.f32 %v1642_v9, %v296_v21  ;;  %v307_v21 = vld [vmem:[%s1248_s25 + $0x340] sm:$0xff]  ;;  %v308_v22 = vld [vmem:[%s1248_s25 + $0x348] sm:$0xff] }
  0x83   : > { %v945_v29 = vsel %vm688_vm7, %v560_v13, %v817_v23  ;;  %1072 = vst [vmem:[%s1282_s30 + $0x2b0] sm:$0xff] %v944_v28  ;;  %vm689_vm8 = vcmp.ge.f32.partialorder %v561_v24, 0.0  ;;  %v818_v32 = vmul.f32 %v1264_v11, %v561_v24  ;;  %vm690_vm9 = vcmp.ge.f32.partialorder %v562_v25, 0.0  ;;  %v305_v13 = vld [vmem:[%s1248_s25 + $0x330] sm:$0xff]  ;;  %v310_v28 = vld [vmem:[%s1248_s25 + $0x358] sm:$0xff] }
  0x84   : > { %1073 = vst [vmem:[%s1282_s30 + $0x2b8] sm:$0xff] %v945_v29  ;;  %v819_v33 = vmul.f32 %v1264_v11, %v562_v25  ;;  %vm691_vm10 = vcmp.ge.f32.partialorder %v563_v26, 0.0  ;;  %v820_v36 = vmul.f32 %v1264_v11, %v563_v26  ;;  %vm692_vm11 = vcmp.ge.f32.partialorder %v564_v27, 0.0 }
  0x85   : > { %v821_v37 = vmul.f32 %v1264_v11, %v564_v27  ;;  %v946_v38 = vsel %vm689_vm8, %v561_v24, %v818_v32  ;;  %v565_v40 = vadd.f32 %v1633_v3, %v430_v30  ;;  %v566_v41 = vadd.f32 %v1633_v3, %v431_v31 }
  0x86   : > { %v947_v39 = vsel %vm690_vm9, %v562_v25, %v819_v33  ;;  %1074 = vst [vmem:[%s1282_s30 + $0x2c0] sm:$0xff] %v946_v38  ;;  %v948_v44 = vsel %vm691_vm10, %v563_v26, %v820_v36  ;;  %v432_v46 = vmul.f32 %v1642_v9, %v297_v34  ;;  %v433_v47 = vmul.f32 %v1642_v9, %v298_v35 }
  0x87   : > { %1075 = vst [vmem:[%s1282_s30 + $0x2c8] sm:$0xff] %v947_v39  ;;  %v949_v45 = vsel %vm692_vm11, %v564_v27, %v821_v37  ;;  %1076 = vst [vmem:[%s1282_s30 + $0x2d0] sm:$0xff] %v948_v44  ;;  %vm693_vm12 = vcmp.ge.f32.partialorder %v565_v40, 0.0  ;;  %v822_v50 = vmul.f32 %v1264_v11, %v565_v40  ;;  %vm694_vm13 = vcmp.ge.f32.partialorder %v566_v41, 0.0  ;;  %v309_v27 = vld [vmem:[%s1248_s25 + $0x350] sm:$0xff]  ;;  %v311_v39 = vld [vmem:[%s1248_s25 + $0x360] sm:$0xff] }
  0x88   : > { %1077 = vst [vmem:[%s1282_s30 + $0x2d8] sm:$0xff] %v949_v45  ;;  %v823_v51 = vmul.f32 %v1264_v11, %v566_v41  ;;  %v567_v52 = vadd.f32 %v1633_v3, %v432_v46  ;;  %v568_v53 = vadd.f32 %v1633_v3, %v433_v47  ;;  %v434_v54 = vmul.f32 %v1642_v9, %v299_v42 }
  0x89   : > { %v435_v55 = vmul.f32 %v1642_v9, %v300_v43  ;;  %v950_v56 = vsel %vm693_vm12, %v565_v40, %v822_v50  ;;  %v436_v58 = vmul.f32 %v1642_v9, %v301_v48  ;;  %v437_v59 = vmul.f32 %v1642_v9, %v302_v49  ;;  %v312_v40 = vld [vmem:[%s1248_s25 + $0x368] sm:$0xff] }
  0x8a   : > { %v951_v57 = vsel %vm694_vm13, %v566_v41, %v823_v51  ;;  %1078 = vst [vmem:[%s1282_s30 + $0x2e0] sm:$0xff] %v950_v56  ;;  %vm695_vm14 = vcmp.ge.f32.partialorder %v567_v52, 0.0  ;;  %v824_v62 = vmul.f32 %v1264_v11, %v567_v52  ;;  %vm696_vm15 = vcmp.ge.f32.partialorder %v568_v53, 0.0 }
  0x8b   : > { %1079 = vst [vmem:[%s1282_s30 + $0x2e8] sm:$0xff] %v951_v57  ;;  %v825_v63 = vmul.f32 %v1264_v11, %v568_v53  ;;  %v569_v2 = vadd.f32 %v1633_v3, %v434_v54  ;;  %v570_v1 = vadd.f32 %v1633_v3, %v435_v55  ;;  %v571_v0 = vadd.f32 %v1633_v3, %v436_v58  ;;  %v314_v54 = vld [vmem:[%s1248_s25 + $0x378] sm:$0xff] }
  0x8c   : > { %v572_v4 = vadd.f32 %v1633_v3, %v437_v59  ;;  %v952_v5 = vsel %vm695_vm14, %v567_v52, %v824_v62  ;;  %v438_v7 = vmul.f32 %v1642_v9, %v303_v60  ;;  %v439_v8 = vmul.f32 %v1642_v9, %v304_v61  ;;  %v315_v61 = vld [vmem:[%s1248_s25 + $0x380] sm:$0xff]  ;;  %v316_v62 = vld [vmem:[%s1248_s25 + $0x388] sm:$0xff] }
  0x8d   : > { %v953_v6 = vsel %vm696_vm15, %v568_v53, %v825_v63  ;;  %1080 = vst [vmem:[%s1282_s30 + $0x2f0] sm:$0xff] %v952_v5  ;;  %vm697_vm0 = vcmp.ge.f32.partialorder %v569_v2, 0.0  ;;  %v826_v10 = vmul.f32 %v1264_v11, %v569_v2  ;;  %vm698_vm1 = vcmp.ge.f32.partialorder %v570_v1, 0.0  ;;  %v313_v53 = vld [vmem:[%s1248_s25 + $0x370] sm:$0xff]  ;;  %v318_v5 = vld [vmem:[%s1248_s25 + $0x398] sm:$0xff] }
  0x8e   : > { %1081 = vst [vmem:[%s1282_s30 + $0x2f8] sm:$0xff] %v953_v6  ;;  %v827_v12 = vmul.f32 %v1264_v11, %v570_v1  ;;  %vm699_vm2 = vcmp.ge.f32.partialorder %v571_v0, 0.0  ;;  %v828_v15 = vmul.f32 %v1264_v11, %v571_v0  ;;  %vm700_vm3 = vcmp.ge.f32.partialorder %v572_v4, 0.0 }
  0x8f   : > { %v829_v16 = vmul.f32 %v1264_v11, %v572_v4  ;;  %v954_v17 = vsel %vm697_vm0, %v569_v2, %v826_v10  ;;  %v573_v19 = vadd.f32 %v1633_v3, %v438_v7  ;;  %v574_v20 = vadd.f32 %v1633_v3, %v439_v8 }
  0x90   : > { %v955_v18 = vsel %vm698_vm1, %v570_v1, %v827_v12  ;;  %1082 = vst [vmem:[%s1282_s30 + $0x300] sm:$0xff] %v954_v17  ;;  %v956_v23 = vsel %vm699_vm2, %v571_v0, %v828_v15  ;;  %v440_v25 = vmul.f32 %v1642_v9, %v305_v13  ;;  %v441_v26 = vmul.f32 %v1642_v9, %v306_v14 }
  0x91   : > { %1083 = vst [vmem:[%s1282_s30 + $0x308] sm:$0xff] %v955_v18  ;;  %v957_v24 = vsel %vm700_vm3, %v572_v4, %v829_v16  ;;  %1084 = vst [vmem:[%s1282_s30 + $0x310] sm:$0xff] %v956_v23  ;;  %vm701_vm4 = vcmp.ge.f32.partialorder %v573_v19, 0.0  ;;  %v830_v29 = vmul.f32 %v1264_v11, %v573_v19  ;;  %vm702_vm5 = vcmp.ge.f32.partialorder %v574_v20, 0.0  ;;  %v317_v4 = vld [vmem:[%s1248_s25 + $0x390] sm:$0xff]  ;;  %v319_v18 = vld [vmem:[%s1248_s25 + $0x3a0] sm:$0xff] }
  0x92   : > { %1085 = vst [vmem:[%s1282_s30 + $0x318] sm:$0xff] %v957_v24  ;;  %v831_v30 = vmul.f32 %v1264_v11, %v574_v20  ;;  %v575_v31 = vadd.f32 %v1633_v3, %v440_v25  ;;  %v576_v32 = vadd.f32 %v1633_v3, %v441_v26  ;;  %v442_v33 = vmul.f32 %v1642_v9, %v307_v21 }
  0x93   : > { %v443_v34 = vmul.f32 %v1642_v9, %v308_v22  ;;  %v958_v35 = vsel %vm701_vm4, %v573_v19, %v830_v29  ;;  %v444_v37 = vmul.f32 %v1642_v9, %v309_v27  ;;  %v445_v38 = vmul.f32 %v1642_v9, %v310_v28  ;;  %v320_v19 = vld [vmem:[%s1248_s25 + $0x3a8] sm:$0xff] }
  0x94   : > { %v959_v36 = vsel %vm702_vm5, %v574_v20, %v831_v30  ;;  %1086 = vst [vmem:[%s1282_s30 + $0x320] sm:$0xff] %v958_v35  ;;  %vm703_vm6 = vcmp.ge.f32.partialorder %v575_v31, 0.0  ;;  %v832_v41 = vmul.f32 %v1264_v11, %v575_v31  ;;  %vm704_vm7 = vcmp.ge.f32.partialorder %v576_v32, 0.0 }
  0x95   : > { %1087 = vst [vmem:[%s1282_s30 + $0x328] sm:$0xff] %v959_v36  ;;  %v833_v42 = vmul.f32 %v1264_v11, %v576_v32  ;;  %v577_v43 = vadd.f32 %v1633_v3, %v442_v33  ;;  %v578_v44 = vadd.f32 %v1633_v3, %v443_v34  ;;  %v579_v45 = vadd.f32 %v1633_v3, %v444_v37  ;;  %v322_v33 = vld [vmem:[%s1248_s25 + $0x3b8] sm:$0xff] }
  0x96   : > { %v580_v46 = vadd.f32 %v1633_v3, %v445_v38  ;;  %v960_v47 = vsel %vm703_vm6, %v575_v31, %v832_v41  ;;  %v446_v49 = vmul.f32 %v1642_v9, %v311_v39  ;;  %v447_v50 = vmul.f32 %v1642_v9, %v312_v40  ;;  %v323_v40 = vld [vmem:[%s1248_s25 + $0x3c0] sm:$0xff]  ;;  %v324_v41 = vld [vmem:[%s1248_s25 + $0x3c8] sm:$0xff] }
  0x97   : > { %v961_v48 = vsel %vm704_vm7, %v576_v32, %v833_v42  ;;  %1088 = vst [vmem:[%s1282_s30 + $0x330] sm:$0xff] %v960_v47  ;;  %vm705_vm8 = vcmp.ge.f32.partialorder %v577_v43, 0.0  ;;  %v834_v51 = vmul.f32 %v1264_v11, %v577_v43  ;;  %vm706_vm9 = vcmp.ge.f32.partialorder %v578_v44, 0.0  ;;  %v321_v32 = vld [vmem:[%s1248_s25 + $0x3b0] sm:$0xff]  ;;  %v326_v47 = vld [vmem:[%s1248_s25 + $0x3d8] sm:$0xff] }
  0x98   : > { %1089 = vst [vmem:[%s1282_s30 + $0x338] sm:$0xff] %v961_v48  ;;  %v835_v52 = vmul.f32 %v1264_v11, %v578_v44  ;;  %vm707_vm10 = vcmp.ge.f32.partialorder %v579_v45, 0.0  ;;  %v836_v55 = vmul.f32 %v1264_v11, %v579_v45  ;;  %vm708_vm11 = vcmp.ge.f32.partialorder %v580_v46, 0.0 }
  0x99   : > { %v837_v56 = vmul.f32 %v1264_v11, %v580_v46  ;;  %v962_v57 = vsel %vm705_vm8, %v577_v43, %v834_v51  ;;  %v581_v59 = vadd.f32 %v1633_v3, %v446_v49  ;;  %v582_v60 = vadd.f32 %v1633_v3, %v447_v50 }
  0x9a   : > { %v963_v58 = vsel %vm706_vm9, %v578_v44, %v835_v52  ;;  %1090 = vst [vmem:[%s1282_s30 + $0x340] sm:$0xff] %v962_v57  ;;  %v964_v63 = vsel %vm707_vm10, %v579_v45, %v836_v55  ;;  %v448_v1 = vmul.f32 %v1642_v9, %v313_v53  ;;  %v449_v0 = vmul.f32 %v1642_v9, %v314_v54 }
  0x9b   : > { %1091 = vst [vmem:[%s1282_s30 + $0x348] sm:$0xff] %v963_v58  ;;  %v965_v2 = vsel %vm708_vm11, %v580_v46, %v837_v56  ;;  %1092 = vst [vmem:[%s1282_s30 + $0x350] sm:$0xff] %v964_v63  ;;  %vm709_vm12 = vcmp.ge.f32.partialorder %v581_v59, 0.0  ;;  %v838_v6 = vmul.f32 %v1264_v11, %v581_v59  ;;  %vm710_vm13 = vcmp.ge.f32.partialorder %v582_v60, 0.0  ;;  %v325_v46 = vld [vmem:[%s1248_s25 + $0x3d0] sm:$0xff]  ;;  %v327_v58 = vld [vmem:[%s1248_s25 + $0x3e0] sm:$0xff] }
  0x9c   : > { %1093 = vst [vmem:[%s1282_s30 + $0x358] sm:$0xff] %v965_v2  ;;  %v839_v7 = vmul.f32 %v1264_v11, %v582_v60  ;;  %v583_v8 = vadd.f32 %v1633_v3, %v448_v1  ;;  %v584_v10 = vadd.f32 %v1633_v3, %v449_v0  ;;  %v450_v12 = vmul.f32 %v1642_v9, %v315_v61 }
  0x9d   : > { %v451_v13 = vmul.f32 %v1642_v9, %v316_v62  ;;  %v966_v14 = vsel %vm709_vm12, %v581_v59, %v838_v6  ;;  %v452_v16 = vmul.f32 %v1642_v9, %v317_v4  ;;  %v453_v17 = vmul.f32 %v1642_v9, %v318_v5  ;;  %v328_v59 = vld [vmem:[%s1248_s25 + $0x3e8] sm:$0xff] }
  0x9e   : > { %v967_v15 = vsel %vm710_vm13, %v582_v60, %v839_v7  ;;  %1094 = vst [vmem:[%s1282_s30 + $0x360] sm:$0xff] %v966_v14  ;;  %vm711_vm14 = vcmp.ge.f32.partialorder %v583_v8, 0.0  ;;  %v840_v20 = vmul.f32 %v1264_v11, %v583_v8  ;;  %vm712_vm15 = vcmp.ge.f32.partialorder %v584_v10, 0.0 }
  0x9f   : > { %1095 = vst [vmem:[%s1282_s30 + $0x368] sm:$0xff] %v967_v15  ;;  %v841_v21 = vmul.f32 %v1264_v11, %v584_v10  ;;  %v585_v22 = vadd.f32 %v1633_v3, %v450_v12  ;;  %v586_v23 = vadd.f32 %v1633_v3, %v451_v13  ;;  %v587_v24 = vadd.f32 %v1633_v3, %v452_v16  ;;  %v330_v12 = vld [vmem:[%s1248_s25 + $0x3f8] sm:$0xff] }
  0xa0   : > { %v588_v25 = vadd.f32 %v1633_v3, %v453_v17  ;;  %v968_v26 = vsel %vm711_vm14, %v583_v8, %v840_v20  ;;  %v454_v28 = vmul.f32 %v1642_v9, %v319_v18  ;;  %v455_v29 = vmul.f32 %v1642_v9, %v320_v19 }
  0xa1   : > { %v969_v27 = vsel %vm712_vm15, %v584_v10, %v841_v21  ;;  %1096 = vst [vmem:[%s1282_s30 + $0x370] sm:$0xff] %v968_v26  ;;  %vm713_vm0 = vcmp.ge.f32.partialorder %v585_v22, 0.0  ;;  %v842_v30 = vmul.f32 %v1264_v11, %v585_v22  ;;  %vm714_vm1 = vcmp.ge.f32.partialorder %v586_v23, 0.0  ;;  %v329_v10 = vld [vmem:[%s1248_s25 + $0x3f0] sm:$0xff] }
  0xa2   : > { %1097 = vst [vmem:[%s1282_s30 + $0x378] sm:$0xff] %v969_v27  ;;  %v843_v31 = vmul.f32 %v1264_v11, %v586_v23  ;;  %vm715_vm2 = vcmp.ge.f32.partialorder %v587_v24, 0.0  ;;  %v844_v34 = vmul.f32 %v1264_v11, %v587_v24  ;;  %vm716_vm3 = vcmp.ge.f32.partialorder %v588_v25, 0.0 }
  0xa3   : > { %v845_v35 = vmul.f32 %v1264_v11, %v588_v25  ;;  %v970_v36 = vsel %vm713_vm0, %v585_v22, %v842_v30  ;;  %v589_v38 = vadd.f32 %v1633_v3, %v454_v28  ;;  %v590_v39 = vadd.f32 %v1633_v3, %v455_v29 }
  0xa4   : > { %v971_v37 = vsel %vm714_vm1, %v586_v23, %v843_v31  ;;  %1098 = vst [vmem:[%s1282_s30 + $0x380] sm:$0xff] %v970_v36  ;;  %v972_v42 = vsel %vm715_vm2, %v587_v24, %v844_v34  ;;  %v456_v44 = vmul.f32 %v1642_v9, %v321_v32  ;;  %v457_v45 = vmul.f32 %v1642_v9, %v322_v33 }
  0xa5   : > { %1099 = vst [vmem:[%s1282_s30 + $0x388] sm:$0xff] %v971_v37  ;;  %v973_v43 = vsel %vm716_vm3, %v588_v25, %v845_v35  ;;  %1100 = vst [vmem:[%s1282_s30 + $0x390] sm:$0xff] %v972_v42  ;;  %vm717_vm4 = vcmp.ge.f32.partialorder %v589_v38, 0.0  ;;  %v846_v48 = vmul.f32 %v1264_v11, %v589_v38  ;;  %vm718_vm5 = vcmp.ge.f32.partialorder %v590_v39, 0.0 }
  0xa6   : > { %1101 = vst [vmem:[%s1282_s30 + $0x398] sm:$0xff] %v973_v43  ;;  %v847_v49 = vmul.f32 %v1264_v11, %v590_v39  ;;  %v591_v50 = vadd.f32 %v1633_v3, %v456_v44  ;;  %v592_v51 = vadd.f32 %v1633_v3, %v457_v45  ;;  %v458_v52 = vmul.f32 %v1642_v9, %v323_v40 }
  0xa7   : > { %v459_v53 = vmul.f32 %v1642_v9, %v324_v41  ;;  %v974_v54 = vsel %vm717_vm4, %v589_v38, %v846_v48  ;;  %v460_v56 = vmul.f32 %v1642_v9, %v325_v46  ;;  %v461_v57 = vmul.f32 %v1642_v9, %v326_v47 }
  0xa8   : > { %v975_v55 = vsel %vm718_vm5, %v590_v39, %v847_v49  ;;  %1102 = vst [vmem:[%s1282_s30 + $0x3a0] sm:$0xff] %v974_v54  ;;  %vm719_vm6 = vcmp.ge.f32.partialorder %v591_v50, 0.0  ;;  %v848_v60 = vmul.f32 %v1264_v11, %v591_v50  ;;  %vm720_vm7 = vcmp.ge.f32.partialorder %v592_v51, 0.0 }
  0xa9   : > { %1103 = vst [vmem:[%s1282_s30 + $0x3a8] sm:$0xff] %v975_v55  ;;  %v849_v61 = vmul.f32 %v1264_v11, %v592_v51  ;;  %v593_v62 = vadd.f32 %v1633_v3, %v458_v52  ;;  %v594_v63 = vadd.f32 %v1633_v3, %v459_v53  ;;  %v595_v2 = vadd.f32 %v1633_v3, %v460_v56 }
  0xaa   : > { %v596_v1 = vadd.f32 %v1633_v3, %v461_v57  ;;  %v976_v0 = vsel %vm719_vm6, %v591_v50, %v848_v60  ;;  %v462_v5 = vmul.f32 %v1642_v9, %v327_v58  ;;  %v463_v6 = vmul.f32 %v1642_v9, %v328_v59 }
  0xab   : > { %v977_v4 = vsel %vm720_vm7, %v592_v51, %v849_v61  ;;  %1104 = vst [vmem:[%s1282_s30 + $0x3b0] sm:$0xff] %v976_v0  ;;  %vm721_vm8 = vcmp.ge.f32.partialorder %v593_v62, 0.0  ;;  %v850_v7 = vmul.f32 %v1264_v11, %v593_v62  ;;  %vm722_vm9 = vcmp.ge.f32.partialorder %v594_v63, 0.0 }
  0xac   : > { %1105 = vst [vmem:[%s1282_s30 + $0x3b8] sm:$0xff] %v977_v4  ;;  %v851_v8 = vmul.f32 %v1264_v11, %v594_v63  ;;  %vm723_vm10 = vcmp.ge.f32.partialorder %v595_v2, 0.0  ;;  %v852_v13 = vmul.f32 %v1264_v11, %v595_v2  ;;  %vm724_vm11 = vcmp.ge.f32.partialorder %v596_v1, 0.0 }
  0xad   : > { %v853_v14 = vmul.f32 %v1264_v11, %v596_v1  ;;  %v978_v15 = vsel %vm721_vm8, %v593_v62, %v850_v7  ;;  %v597_v17 = vadd.f32 %v1633_v3, %v462_v5  ;;  %v598_v18 = vadd.f32 %v1633_v3, %v463_v6 }
  0xae   : > { %v979_v16 = vsel %vm722_vm9, %v594_v63, %v851_v8  ;;  %1106 = vst [vmem:[%s1282_s30 + $0x3c0] sm:$0xff] %v978_v15  ;;  %v980_v19 = vsel %vm723_vm10, %v595_v2, %v852_v13  ;;  %v464_v21 = vmul.f32 %v1642_v9, %v329_v10  ;;  %v465_v22 = vmul.f32 %v1642_v9, %v330_v12 }
  0xaf   : > { %1107 = vst [vmem:[%s1282_s30 + $0x3c8] sm:$0xff] %v979_v16  ;;  %v981_v20 = vsel %vm724_vm11, %v596_v1, %v853_v14  ;;  %1108 = vst [vmem:[%s1282_s30 + $0x3d0] sm:$0xff] %v980_v19  ;;  %vm725_vm12 = vcmp.ge.f32.partialorder %v597_v17, 0.0  ;;  %v854_v23 = vmul.f32 %v1264_v11, %v597_v17  ;;  %vm726_vm13 = vcmp.ge.f32.partialorder %v598_v18, 0.0 }
  0xb0   : > { %1109 = vst [vmem:[%s1282_s30 + $0x3d8] sm:$0xff] %v981_v20  ;;  %v855_v24 = vmul.f32 %v1264_v11, %v598_v18  ;;  %v599_v25 = vadd.f32 %v1633_v3, %v464_v21  ;;  %v600_v26 = vadd.f32 %v1633_v3, %v465_v22 }
  0xb1   : > { %v982_v27 = vsel %vm725_vm12, %v597_v17, %v854_v23 }
  0xb2   : > { %v983_v28 = vsel %vm726_vm13, %v598_v18, %v855_v24  ;;  %1110 = vst [vmem:[%s1282_s30 + $0x3e0] sm:$0xff] %v982_v27  ;;  %vm727_vm14 = vcmp.ge.f32.partialorder %v599_v25, 0.0  ;;  %v856_v9 = vmul.f32 %v1264_v11, %v599_v25  ;;  %vm728_vm15 = vcmp.ge.f32.partialorder %v600_v26, 0.0 }
  0xb3   : > { %1111 = vst [vmem:[%s1282_s30 + $0x3e8] sm:$0xff] %v983_v28  ;;  %v857_v29 = vmul.f32 %v1264_v11, %v600_v26 }
  0xb4   : > { %v984_v30 = vsel %vm727_vm14, %v599_v25, %v856_v9 }
  0xb5   : > { %v985_v31 = vsel %vm728_vm15, %v600_v26, %v857_v29  ;;  %1112 = vst [vmem:[%s1282_s30 + $0x3f0] sm:$0xff] %v984_v30 }
  0xb6   : > { %1113 = vst [vmem:[%s1282_s30 + $0x3f8] sm:$0xff] %v985_v31 }
  0xb7 PF: > { %s15_s17 = sadd.s32 1, %s1199_s17  }
  0xb8   : > { %p12_p4 = scmp.ge.s32.totalorder %s15_s17, 4  }
  0xba   :  { %14 = sbr.rel (!%p12_p4) target bundleno = 2 (0x2), region = 66 }

</bundles_post_ra>
